<compile_context>
chip_gen: v7x
topology: tpu7x:2x2x1
jax: 0.10.0
libtpu: 0.0.40
codegen_flags: <defaults>
</compile_context>

<pallas_src>
import jax
import jax.numpy as jnp
from jax.experimental import pallas as pl
from jax.experimental.pallas import tpu as pltpu

TILE_B = 256     # rows per grid step (multiple of MXU edge on v6e/v7x; 2x128 on v5e)
OUT_PAD = 128    # fc3 output padded to a full lane width for unmasked stores


def fashion_dnn_kernel(x_ref, w1_ref, b1_ref, w2_ref, b2_ref, w3_ref, b3_ref, o_ref):
    """One batch tile of the full forward pass.

    x:  (TILE_B, 784)  bf16
    w1: (784, 256) bf16, b1: (1, 256) f32
    w2: (256, 128) bf16, b2: (1, 128) f32
    w3: (128, 128) bf16 (zero-padded cols 10..127), b3: (1, 128) f32
    o:  (TILE_B, 128) f32 (cols 10..127 are padding)
    """
    x = x_ref[...]

    # fc1 + ReLU (accumulate f32, bias/ReLU in f32, downcast for next MXU pass)
    h1 = jnp.dot(x, w1_ref[...], preferred_element_type=jnp.float32) + b1_ref[...]
    h1 = jnp.maximum(h1, 0.0).astype(jnp.bfloat16)

    # Dropout(0.25): identity in eval mode.

    # fc2 + ReLU
    h2 = jnp.dot(h1, w2_ref[...], preferred_element_type=jnp.float32) + b2_ref[...]
    h2 = jnp.maximum(h2, 0.0).astype(jnp.bfloat16)

    # fc3 (logits, lane-dense padded output)
    o_ref[...] = jnp.dot(h2, w3_ref[...], preferred_element_type=jnp.float32) + b3_ref[...]


def fashion_dnn_forward(x_nchw, params):
    """x_nchw: (B, 1, 28, 28) float32. Returns logits (B, 10) float32."""
    B = x_nchw.shape[0]
    x = x_nchw.reshape(B, 784).astype(jnp.bfloat16)   # same as torch .view(-1, 784)

    # Pad batch to a multiple of TILE_B so every grid step presents a full M tile.
    B_pad = pl.cdiv(B, TILE_B) * TILE_B
    if B_pad != B:
        x = jnp.pad(x, ((0, B_pad - B), (0, 0)))

    w1, b1, w2, b2, w3, b3 = params

    # Lane-dense fc3: zero-pad output dim 10 -> 128 (extra columns are free MXU work).
    w3p = jnp.pad(w3, ((0, 0), (0, OUT_PAD - w3.shape[1])))
    b3p = jnp.pad(b3, ((0, 0), (0, OUT_PAD - b3.shape[1])))

    # bf16 weights for the MXU; biases stay f32 (added to f32 accumulator).
    w1b = w1.astype(jnp.bfloat16)
    w2b = w2.astype(jnp.bfloat16)
    w3b = w3p.astype(jnp.bfloat16)
    b1f = b1.astype(jnp.float32)
    b2f = b2.astype(jnp.float32)
    b3f = b3p.astype(jnp.float32)

    grid = (B_pad // TILE_B,)

    def resident(shape):
        # Weights/biases: same block every grid step -> DMA'd once, VMEM-resident.
        return pl.BlockSpec(shape, lambda i: tuple(0 for _ in shape))

    weight_bytes = (784 * 256 + 256 * 128 + 128 * OUT_PAD) * 2 \
                   + (256 + 128 + OUT_PAD) * 4
    cost = pl.CostEstimate(
        flops=2 * B_pad * (784 * 256 + 256 * 128 + 128 * OUT_PAD),
        transcendentals=0,
        bytes_accessed=B_pad * 784 * 2 + weight_bytes + B_pad * OUT_PAD * 4,
    )

    out_padded = pl.pallas_call(
        fashion_dnn_kernel,
        out_shape=jax.ShapeDtypeStruct((B_pad, OUT_PAD), jnp.float32),
        grid=grid,
        in_specs=[
            pl.BlockSpec((TILE_B, 784), lambda i: (i, 0)),
            resident(w1b.shape), resident(b1f.shape),
            resident(w2b.shape), resident(b2f.shape),
            resident(w3b.shape), resident(b3f.shape),
        ],
        out_specs=pl.BlockSpec((TILE_B, OUT_PAD), lambda i: (i, 0)),
        compiler_params=pltpu.CompilerParams(
            dimension_semantics=("parallel",),
            vmem_limit_bytes=16 << 20,
        ),
        cost_estimate=cost,
    )(x, w1b, b1f, w2b, b2f, w3b, b3f)

    # Strip batch padding and the 118 padded logit columns.
    return out_padded[:B, :10]


def init_params(key):
    """Deterministic init mimicking PyTorch nn.Linear default (uniform +/- 1/sqrt(fan_in)).

    Weights stored transposed vs. PyTorch, i.e. (in_features, out_features).
    Biases stored as (1, out_features) for 2-D broadcasting inside the kernel.
    """
    dims = [(784, 256), (256, 128), (128, 10)]
    params = []
    for (fan_in, fan_out) in dims:
        key, kw, kb = jax.random.split(key, 3)
        bound = 1.0 / jnp.sqrt(float(fan_in))
        w = jax.random.uniform(kw, (fan_in, fan_out), jnp.float32, -bound, bound)
        b = jax.random.uniform(kb, (1, fan_out), jnp.float32, -bound, bound)
        params.extend([w, b])
    return tuple(params)


def reference_forward(x_nchw, params):
    """Pure-JAX f32 reference for correctness checking."""
    w1, b1, w2, b2, w3, b3 = params
    x = x_nchw.reshape(x_nchw.shape[0], 784)
    h1 = jnp.maximum(x @ w1 + b1, 0.0)
    h2 = jnp.maximum(h1 @ w2 + b2, 0.0)
    return h2 @ w3 + b3


if __name__ == "__main__":
    key = jax.random.PRNGKey(0)
    key, kx = jax.random.split(key)

    # Small batch of "Fashion-MNIST"-shaped inputs: NCHW (2, 1, 28, 28)
    x = jax.random.normal(kx, (2, 1, 28, 28), jnp.float32)

    params = init_params(jax.random.PRNGKey(0))

    out = fashion_dnn_forward(x, params)
    out = jax.block_until_ready(out)

    ref = reference_forward(x, params)
    assert out.shape == (2, 10), out.shape
    # bf16 operands with f32 accumulation -> loosened tolerance vs f32 reference.
    assert jnp.allclose(out, ref, atol=5e-2, rtol=5e-2), (
        "mismatch vs pure-JAX reference: max abs diff = "
        f"{float(jnp.max(jnp.abs(out - ref)))}")

    print("KERNEL_OK")
</pallas_src>

<mosaic_0001>
module attributes {stable_mosaic.version = 11 : i64} {
  func.func @fashion_dnn_kernel(%arg0: i32, %arg1: memref<256x784xbf16, #tpu.memory_space<vmem>>, %arg2: memref<784x256xbf16, #tpu.memory_space<vmem>>, %arg3: memref<1x256xf32, #tpu.memory_space<vmem>>, %arg4: memref<256x128xbf16, #tpu.memory_space<vmem>>, %arg5: memref<1x128xf32, #tpu.memory_space<vmem>>, %arg6: memref<128x128xbf16, #tpu.memory_space<vmem>>, %arg7: memref<1x128xf32, #tpu.memory_space<vmem>>, %arg8: memref<256x128xf32, #tpu.memory_space<vmem>>) attributes {dimension_semantics = [#tpu.dimension_semantics<parallel>], iteration_bounds = array<i64: 1>, scalar_prefetch = 0 : i64, scratch_operands = 0 : i64, tpu.core_type = #tpu.core_type<tc>, window_params = [{transform_indices = @transform_0, window_bounds = array<i64: 256, 784>}, {pipeline_mode = #tpu.pipeline_mode<synchronous>, transform_indices = @transform_1, window_bounds = array<i64: 784, 256>}, {pipeline_mode = #tpu.pipeline_mode<synchronous>, transform_indices = @transform_2, window_bounds = array<i64: 1, 256>}, {pipeline_mode = #tpu.pipeline_mode<synchronous>, transform_indices = @transform_3, window_bounds = array<i64: 256, 128>}, {pipeline_mode = #tpu.pipeline_mode<synchronous>, transform_indices = @transform_4, window_bounds = array<i64: 1, 128>}, {pipeline_mode = #tpu.pipeline_mode<synchronous>, transform_indices = @transform_5, window_bounds = array<i64: 128, 128>}, {pipeline_mode = #tpu.pipeline_mode<synchronous>, transform_indices = @transform_6, window_bounds = array<i64: 1, 128>}, {transform_indices = @transform_7, window_bounds = array<i64: 256, 128>}]} {
    %c0 = arith.constant 0 : index
    %c0_0 = arith.constant 0 : index
    %0 = vector.load %arg1[%c0, %c0_0] : memref<256x784xbf16, #tpu.memory_space<vmem>>, vector<256x784xbf16>
    %c0_1 = arith.constant 0 : index
    %c0_2 = arith.constant 0 : index
    %1 = vector.load %arg2[%c0_1, %c0_2] : memref<784x256xbf16, #tpu.memory_space<vmem>>, vector<784x256xbf16>
    %cst = arith.constant dense<0.000000e+00> : vector<256x256xf32>
    %2 = tpu.matmul %0, %1, %cst {dimension_numbers = #tpu.dot_dimension_numbers<[1], [0], [0], [1], [0, 0, 1, 1], [], []>} : vector<256x784xbf16>, vector<784x256xbf16>, vector<256x256xf32> -> vector<256x256xf32>
    %c0_3 = arith.constant 0 : index
    %c0_4 = arith.constant 0 : index
    %3 = vector.load %arg3[%c0_3, %c0_4] : memref<1x256xf32, #tpu.memory_space<vmem>>, vector<1x256xf32>
    %4 = vector.broadcast %3 : vector<1x256xf32> to vector<256x256xf32>
    %5 = arith.addf %2, %4 : vector<256x256xf32>
    %cst_5 = arith.constant 0.000000e+00 : f32
    %6 = vector.broadcast %cst_5 : f32 to vector<256x256xf32>
    %7 = arith.maximumf %5, %6 : vector<256x256xf32>
    %8 = arith.truncf %7 : vector<256x256xf32> to vector<256x256xbf16>
    %c0_6 = arith.constant 0 : index
    %c0_7 = arith.constant 0 : index
    %9 = vector.load %arg4[%c0_6, %c0_7] : memref<256x128xbf16, #tpu.memory_space<vmem>>, vector<256x128xbf16>
    %cst_8 = arith.constant dense<0.000000e+00> : vector<256x128xf32>
    %10 = tpu.matmul %8, %9, %cst_8 {dimension_numbers = #tpu.dot_dimension_numbers<[1], [0], [0], [1], [0, 0, 1, 1], [], []>} : vector<256x256xbf16>, vector<256x128xbf16>, vector<256x128xf32> -> vector<256x128xf32>
    %c0_9 = arith.constant 0 : index
    %c0_10 = arith.constant 0 : index
    %11 = vector.load %arg5[%c0_9, %c0_10] : memref<1x128xf32, #tpu.memory_space<vmem>>, vector<1x128xf32>
    %12 = vector.broadcast %11 : vector<1x128xf32> to vector<256x128xf32>
    %13 = arith.addf %10, %12 : vector<256x128xf32>
    %cst_11 = arith.constant 0.000000e+00 : f32
    %14 = vector.broadcast %cst_11 : f32 to vector<256x128xf32>
    %15 = arith.maximumf %13, %14 : vector<256x128xf32>
    %16 = arith.truncf %15 : vector<256x128xf32> to vector<256x128xbf16>
    %c0_12 = arith.constant 0 : index
    %c0_13 = arith.constant 0 : index
    %17 = vector.load %arg6[%c0_12, %c0_13] : memref<128x128xbf16, #tpu.memory_space<vmem>>, vector<128x128xbf16>
    %cst_14 = arith.constant dense<0.000000e+00> : vector<256x128xf32>
    %18 = tpu.matmul %16, %17, %cst_14 {dimension_numbers = #tpu.dot_dimension_numbers<[1], [0], [0], [1], [0, 0, 1, 1], [], []>} : vector<256x128xbf16>, vector<128x128xbf16>, vector<256x128xf32> -> vector<256x128xf32>
    %c0_15 = arith.constant 0 : index
    %c0_16 = arith.constant 0 : index
    %19 = vector.load %arg7[%c0_15, %c0_16] : memref<1x128xf32, #tpu.memory_space<vmem>>, vector<1x128xf32>
    %20 = vector.broadcast %19 : vector<1x128xf32> to vector<256x128xf32>
    %21 = arith.addf %18, %20 : vector<256x128xf32>
    %c0_17 = arith.constant 0 : index
    %c0_18 = arith.constant 0 : index
    %22 = vector.load %arg8[%c0_17, %c0_18] : memref<256x128xf32, #tpu.memory_space<vmem>>, vector<256x128xf32>
    tpu.vector_store %arg8[%c0_17, %c0_18], %21 {strides = array<i32>} : memref<256x128xf32, #tpu.memory_space<vmem>>, vector<256x128xf32>,
    return
  }
  func.func @transform_0(%arg0: i32) -> (i32, i32) {
    %c0_i32 = arith.constant 0 : i32
    %c0_i32_0 = arith.constant 0 : i32
    return %arg0, %c0_i32 : i32, i32
  }
  func.func @transform_1(%arg0: i32) -> (i32, i32) {
    %c0_i32 = arith.constant 0 : i32
    %c0_i32_0 = arith.constant 0 : i32
    %c0_i32_1 = arith.constant 0 : i32
    return %c0_i32, %c0_i32_0 : i32, i32
  }
  func.func @transform_2(%arg0: i32) -> (i32, i32) {
    %c0_i32 = arith.constant 0 : i32
    %c0_i32_0 = arith.constant 0 : i32
    %c0_i32_1 = arith.constant 0 : i32
    return %c0_i32, %c0_i32_0 : i32, i32
  }
  func.func @transform_3(%arg0: i32) -> (i32, i32) {
    %c0_i32 = arith.constant 0 : i32
    %c0_i32_0 = arith.constant 0 : i32
    %c0_i32_1 = arith.constant 0 : i32
    return %c0_i32, %c0_i32_0 : i32, i32
  }
  func.func @transform_4(%arg0: i32) -> (i32, i32) {
    %c0_i32 = arith.constant 0 : i32
    %c0_i32_0 = arith.constant 0 : i32
    %c0_i32_1 = arith.constant 0 : i32
    return %c0_i32, %c0_i32_0 : i32, i32
  }
  func.func @transform_5(%arg0: i32) -> (i32, i32) {
    %c0_i32 = arith.constant 0 : i32
    %c0_i32_0 = arith.constant 0 : i32
    %c0_i32_1 = arith.constant 0 : i32
    return %c0_i32, %c0_i32_0 : i32, i32
  }
  func.func @transform_6(%arg0: i32) -> (i32, i32) {
    %c0_i32 = arith.constant 0 : i32
    %c0_i32_0 = arith.constant 0 : i32
    %c0_i32_1 = arith.constant 0 : i32
    return %c0_i32, %c0_i32_0 : i32, i32
  }
  func.func @transform_7(%arg0: i32) -> (i32, i32) {
    %c0_i32 = arith.constant 0 : i32
    %c0_i32_0 = arith.constant 0 : i32
    return %arg0, %c0_i32 : i32, i32
  }
}

</mosaic_0001>

<bundles_post_ra>
// kernel: tpu_custom_call.1
= control target key start
LH: loop header
LB: loop body
LE: loop exit
PB: predicated region body
PF: predicated region fallthrough
CT: control target
= control target key end

     0   :  { %s5195_s0 = inlined_call_operand.vmem [shape: bf16[256,784], index: 0, kind: input, shape index: {}]   ;;  %s5196_s1 = inlined_call_operand.vmem [shape: bf16[784,256], index: 1, kind: input, shape index: {}]   ;;  %s5197_s2 = inlined_call_operand.vmem [shape: f32[1,256], index: 2, kind: input, shape index: {}]   ;;  %s5198_s3 = inlined_call_operand.vmem [shape: bf16[256,128], index: 3, kind: input, shape index: {}]   ;;  %s5199_s4 = inlined_call_operand.vmem [shape: f32[1,128], index: 4, kind: input, shape index: {}]   ;;  %s5200_s5 = inlined_call_operand.vmem [shape: bf16[128,128], index: 5, kind: input, shape index: {}]   ;;  %s5201_s6 = inlined_call_operand.vmem [shape: f32[1,128], index: 6, kind: input, shape index: {}]   ;;  %s5202_s7 = inlined_call_operand.hbm [shape: f32[256,128], index: 7, kind: output, shape index: {}]  }
   0x1   :  { %v3987_v0 = vld [vmem:[%s5196_s1 + $0x104] ss:$8 sps:$4 sm:$0xff]   ;;  %v3992_v1 = vld [vmem:[%s5196_s1 + $0x100] ss:$8 sps:$4 sm:$0xff]   ;;  %v3998_v2 = vld [vmem:[%s5196_s1 + $0x114] ss:$8 sps:$4 sm:$0xff]  }
   0x2   :  { %1558 = vmatprep.subr.bf16.mxu0 %v3987_v0  ;;  %v4004_v3 = vld [vmem:[%s5196_s1 + $0x110] ss:$8 sps:$4 sm:$0xff]   ;;  %v4010_v4 = vld [vmem:[%s5196_s1 + $0x124] ss:$8 sps:$4 sm:$0xff]   ;;  %v4016_v5 = vld [vmem:[%s5196_s1 + $0x120] ss:$8 sps:$4 sm:$0xff]  }
   0x3   :  { %1559 = vmatpush1.bf16.msra.mxu0 %v3992_v1  ;;  %v4022_v6 = vld [vmem:[%s5196_s1 + $0x134] ss:$8 sps:$4 sm:$0xff]   ;;  %v4028_v7 = vld [vmem:[%s5196_s1 + $0x130] ss:$8 sps:$4 sm:$0xff]   ;;  %v4034_v8 = vld [vmem:[%s5196_s1 + $0x144] ss:$8 sps:$4 sm:$0xff]  }
   0x4   :  { %1560 = vmatprep.subr.bf16.mxu0 %v3998_v2  ;;  %v4040_v9 = vld [vmem:[%s5196_s1 + $0x140] ss:$8 sps:$4 sm:$0xff]   ;;  %v4046_v10 = vld [vmem:[%s5196_s1 + $0x154] ss:$8 sps:$4 sm:$0xff]   ;;  %v4052_v11 = vld [vmem:[%s5196_s1 + $0x150] ss:$8 sps:$4 sm:$0xff]  }
   0x5   :  { %v4058_v12 = vld [vmem:[%s5196_s1 + $0x164] ss:$8 sps:$4 sm:$0xff]   ;;  %v4067_v14 = vld [vmem:[%s5196_s1 + $0x160] ss:$8 sps:$4 sm:$0xff]   ;;  %v4073_v15 = vld [vmem:[%s5196_s1 + $0x174] ss:$8 sps:$4 sm:$0xff]  }
   0x6   :  { %v3635_v13 = vld [vmem:[%s5195_s0 + $0xc] ss:$28 sps:$4 sm:$0xff]   ;;  %v4079_v16 = vld [vmem:[%s5196_s1 + $0x170] ss:$8 sps:$4 sm:$0xff]   ;;  %v4097_v19 = vld [vmem:[%s5196_s1 + $0x194] ss:$8 sps:$4 sm:$0xff]  }
   0x7   :  { %1561 = vmatpush1.bf16.msra.mxu0 %v4004_v3  ;;  %1590 = vmatprep.mubr.bf16.mxu0 %v3635_v13  ;;  %v4085_v17 = vld [vmem:[%s5196_s1 + $0x184] ss:$8 sps:$4 sm:$0xff]   ;;  %v4091_v18 = vld [vmem:[%s5196_s1 + $0x180] ss:$8 sps:$4 sm:$0xff]   ;;  %v4103_v20 = vld [vmem:[%s5196_s1 + $0x190] ss:$8 sps:$4 sm:$0xff]  }
   0x8   :  { %1562 = vmatprep.subr.bf16.mxu0 %v4010_v4  ;;  %v4109_v21 = vld [vmem:[%s5196_s1 + $0x1a4] ss:$8 sps:$4 sm:$0xff]   ;;  %v4115_v22 = vld [vmem:[%s5196_s1 + $0x1a0] ss:$8 sps:$4 sm:$0xff]   ;;  %v4121_v23 = vld [vmem:[%s5196_s1 + $0x1b4] ss:$8 sps:$4 sm:$0xff]  }
   0x9   :  { %v4127_v24 = vld [vmem:[%s5196_s1 + $0x1b0] ss:$8 sps:$4 sm:$0xff]   ;;  %v4133_v25 = vld [vmem:[%s5196_s1 + $0x1c4] ss:$8 sps:$4 sm:$0xff]   ;;  %v4139_v26 = vld [vmem:[%s5196_s1 + $0x1c0] ss:$8 sps:$4 sm:$0xff]  }
   0xa   :  { %v4145_v27 = vld [vmem:[%s5196_s1 + $0x1d4] ss:$8 sps:$4 sm:$0xff]   ;;  %v4151_v28 = vld [vmem:[%s5196_s1 + $0x1d0] ss:$8 sps:$4 sm:$0xff]   ;;  %v4157_v29 = vld [vmem:[%s5196_s1 + $0x1e4] ss:$8 sps:$4 sm:$0xff]  }
   0xb   :  { %1563 = vmatpush1.bf16.msra.mxu0 %v4016_v5  ;;  %v4163_v30 = vld [vmem:[%s5196_s1 + $0x1e0] ss:$8 sps:$4 sm:$0xff]   ;;  %v4169_v31 = vld [vmem:[%s5196_s1 + $0x1f4] ss:$8 sps:$4 sm:$0xff]   ;;  %v4174_v32 = vld [vmem:[%s5196_s1 + $0x1f0] ss:$8 sps:$4 sm:$0xff]  }
   0xc   :  { %1564 = vmatprep.subr.bf16.mxu0 %v4022_v6  ;;  %v3717_v33 = vld [vmem:[%s5196_s1 + $0x4] ss:$8 sps:$4 sm:$0xff]   ;;  %v3719_v34 = vld [vmem:[%s5196_s1] ss:$8 sps:$4 sm:$0xff]   ;;  %v3723_v38 = vld [vmem:[%s5196_s1 + $0x14] ss:$8 sps:$4 sm:$0xff]  }
   0xd   :  { %v3633_v35 = vld [vmem:[%s5195_s0 + $0x8] ss:$28 sps:$4 sm:$0xff]   ;;  %1365 = vmatprep.subr.bf16.mxu1 %v3717_v33  ;;  %v3641_v39 = vld [vmem:[%s5196_s1 + $0x214] ss:$8 sps:$4 sm:$0xff]   ;;  %v3728_v41 = vld [vmem:[%s5196_s1 + $0x10] ss:$8 sps:$4 sm:$0xff]  }
   0xe   :  { %v3638_v36 = vld [vmem:[%s5196_s1 + $0x204] ss:$8 sps:$4 sm:$0xff]   ;;  %v3636_v37 = vld [vmem:[%s5196_s1 + $0x200] ss:$8 sps:$4 sm:$0xff]   ;;  %1366 = vmatpush1.bf16.msra.mxu1 %v3719_v34  ;;  %v3639_v44 = vld [vmem:[%s5196_s1 + $0x210] ss:$8 sps:$4 sm:$0xff]  }
   0xf   :  { %1565 = vmatpush1.bf16.msra.mxu0 %v4028_v7  ;;  %v3642_v40 = vld [vmem:[%s5195_s0 + $0x44] ss:$28 sps:$4 sm:$0xff]   ;;  %1367 = vmatprep.subr.bf16.mxu1 %v3723_v38  ;;  %v3734_v45 = vld [vmem:[%s5196_s1 + $0x34] ss:$8 sps:$4 sm:$0xff]   ;;  %v3737_v48 = vld [vmem:[%s5196_s1 + $0x30] ss:$8 sps:$4 sm:$0xff]  }
  0x10   :  { %1566 = vmatprep.subr.bf16.mxu0 %v4034_v8  ;;  %v3729_v42 = vld [vmem:[%s5196_s1 + $0x24] ss:$8 sps:$4 sm:$0xff]   ;;  %v3731_v43 = vld [vmem:[%s5196_s1 + $0x20] ss:$8 sps:$4 sm:$0xff]   ;;  %v3648_v50 = vld [vmem:[%s5195_s0 + $0x7c] ss:$28 sps:$4 sm:$0xff]  }
  0x11   :  { %v3647_v46 = vld [vmem:[%s5196_s1 + $0x224] ss:$8 sps:$4 sm:$0xff]   ;;  %v3644_v47 = vld [vmem:[%s5195_s0 + $0x40] ss:$28 sps:$4 sm:$0xff]   ;;  %v3651_v54 = vld [vmem:[%s5196_s1 + $0x230] ss:$8 sps:$4 sm:$0xff]  }
  0x12   :  { %1368 = vmatpush1.bf16.msra.mxu1 %v3728_v41  ;;  %v3645_v49 = vld [vmem:[%s5196_s1 + $0x220] ss:$8 sps:$4 sm:$0xff]   ;;  %v3653_v51 = vld [vmem:[%s5196_s1 + $0x234] ss:$8 sps:$4 sm:$0xff]   ;;  %v3738_v52 = vld [vmem:[%s5196_s1 + $0x44] ss:$8 sps:$4 sm:$0xff]  }
  0x13   :  { %1567 = vmatpush1.bf16.msra.mxu0 %v4040_v9  ;;  %1369 = vmatprep.subr.bf16.mxu1 %v3729_v42  ;;  %v3740_v53 = vld [vmem:[%s5196_s1 + $0x40] ss:$8 sps:$4 sm:$0xff]   ;;  %v3743_v55 = vld [vmem:[%s5196_s1 + $0x54] ss:$8 sps:$4 sm:$0xff]   ;;  %v3659_v56 = vld [vmem:[%s5196_s1 + $0x244] ss:$8 sps:$4 sm:$0xff]  }
  0x14   :  { %1568 = vmatprep.subr.bf16.mxu0 %v4046_v10  ;;  %v3650_v57 = vld [vmem:[%s5195_s0 + $0x78] ss:$28 sps:$4 sm:$0xff]   ;;  %v3657_v60 = vld [vmem:[%s5196_s1 + $0x240] ss:$8 sps:$4 sm:$0xff]   ;;  %v3747_v62 = vld [vmem:[%s5196_s1 + $0x64] ss:$8 sps:$4 sm:$0xff]  }
  0x15   :  { %v3746_v58 = vld [vmem:[%s5196_s1 + $0x50] ss:$8 sps:$4 sm:$0xff]   ;;  %v3662_v61 = vld [vmem:[%s5196_s1 + $0x254] ss:$8 sps:$4 sm:$0xff]   ;;  %v3749_v63 = vld [vmem:[%s5196_s1 + $0x60] ss:$8 sps:$4 sm:$0xff]  }
  0x16   :  { %1370 = vmatpush1.bf16.msra.mxu1 %v3731_v43  ;;  %v3654_v59 = vld [vmem:[%s5195_s0 + $0xb4] ss:$28 sps:$4 sm:$0xff]   ;;  %v3668_v34 = vld [vmem:[%s5196_s1 + $0x264] ss:$8 sps:$4 sm:$0xff]   ;;  %v3666_v38 = vld [vmem:[%s5196_s1 + $0x260] ss:$8 sps:$4 sm:$0xff]  }
  0x17   :  { %1569 = vmatpush1.bf16.msra.mxu0 %v4052_v11  ;;  %1371 = vmatprep.subr.bf16.mxu1 %v3734_v45  ;;  %v3660_v13 = vld [vmem:[%s5196_s1 + $0x250] ss:$8 sps:$4 sm:$0xff]   ;;  %v3752_v33 = vld [vmem:[%s5196_s1 + $0x74] ss:$8 sps:$4 sm:$0xff]   ;;  %v3758_v41 = vld [vmem:[%s5196_s1 + $0x80] ss:$8 sps:$4 sm:$0xff]  }
  0x18   :  { %1570 = vmatprep.subr.bf16.mxu0 %v4058_v12  ;;  %v3672_v42 = vld [vmem:[%s5196_s1 + $0x270] ss:$8 sps:$4 sm:$0xff]   ;;  %v3761_v43 = vld [vmem:[%s5196_s1 + $0x94] ss:$8 sps:$4 sm:$0xff]   ;;  %v3680_v45 = vld [vmem:[%s5196_s1 + $0x284] ss:$8 sps:$4 sm:$0xff]  }
  0x1a   :  { %1372 = vmatpush1.bf16.msra.mxu1 %v3737_v48  ;;  %v3794_v48 = vld [vmem:[%s5195_s0 + $0x4] ss:$28 sps:$4 sm:$0xff]  }
  0x1b   :  { %1571 = vmatpush1.bf16.msra.mxu0 %v4067_v14  ;;  %1373 = vmatprep.subr.bf16.mxu1 %v3738_v52  ;;  %v3681_v52 = vld [vmem:[%s5196_s1 + $0x290] ss:$8 sps:$4 sm:$0xff]  }
  0x1c   :  { %1572 = vmatprep.subr.bf16.mxu0 %v4073_v15  ;;  %1397 = vmatprep.mubr.bf16.mxu1 %v3794_v48  ;;  %v3716_v48 = vld [vmem:[%s5196_s1 + $0x2f4] ss:$8 sps:$4 sm:$0xff]  }
  0x1e   :  { %1374 = vmatpush1.bf16.msra.mxu1 %v3740_v53  ;;  %v3689_v53 = vld [vmem:[%s5196_s1 + $0x2a4] ss:$8 sps:$4 sm:$0xff]  }
  0x1f   :  { %1573 = vmatpush1.bf16.msra.mxu0 %v4079_v16  ;;  %1375 = vmatprep.subr.bf16.mxu1 %v3743_v55  ;;  %v3770_v55 = vld [vmem:[%s5196_s1 + $0xb4] ss:$8 sps:$4 sm:$0xff]  }
  0x20   :  { %1574 = vmatprep.subr.bf16.mxu0 %v4085_v17 }
  0x22   :  { %1376 = vmatpush1.bf16.msra.mxu1 %v3746_v58  ;;  %v3675_v58 = vld [vmem:[%s5195_s0 + $0x15c] ss:$28 sps:$4 sm:$0xff]  }
  0x23   :  { %1575 = vmatpush1.bf16.msra.mxu0 %v4091_v18  ;;  %1377 = vmatprep.subr.bf16.mxu1 %v3747_v62  ;;  %v3693_v62 = vld [vmem:[%s5196_s1 + $0x2b0] ss:$8 sps:$4 sm:$0xff]  }
  0x24   :  { %1576 = vmatprep.subr.bf16.mxu0 %v4097_v19 }
  0x26   :  { %1378 = vmatpush1.bf16.msra.mxu1 %v3749_v63  ;;  %v3701_v63 = vld [vmem:[%s5196_s1 + $0x2c4] ss:$8 sps:$4 sm:$0xff]  }
  0x27   :  { %1577 = vmatpush1.bf16.msra.mxu0 %v4103_v20  ;;  %1379 = vmatprep.subr.bf16.mxu1 %v3752_v33  ;;  %v3779_v33 = vld [vmem:[%s5196_s1 + $0xd4] ss:$8 sps:$4 sm:$0xff]  }
  0x28   :  { %1578 = vmatprep.subr.bf16.mxu0 %v4109_v21 }
  0x2b   :  { %1579 = vmatpush1.bf16.msra.mxu0 %v4115_v22 }
  0x2c   :  { %1580 = vmatprep.subr.bf16.mxu0 %v4121_v23 }
  0x2f   :  { %1581 = vmatpush1.bf16.msra.mxu0 %v4127_v24 }
  0x30   :  { %1582 = vmatprep.subr.bf16.mxu0 %v4133_v25 }
  0x33   :  { %1583 = vmatpush1.bf16.msra.mxu0 %v4139_v26 }
  0x34   :  { %1584 = vmatprep.subr.bf16.mxu0 %v4145_v27 }
  0x37   :  { %1585 = vmatpush1.bf16.msra.mxu0 %v4151_v28 }
  0x38   :  { %1586 = vmatprep.subr.bf16.mxu0 %v4157_v29 }
  0x3b   :  { %1587 = vmatpush1.bf16.msra.mxu0 %v4163_v30 }
  0x3c   :  { %1588 = vmatprep.subr.bf16.mxu0 %v4169_v31 }
  0x3f   :  { %1589 = vmatpush1.bf16.msra.mxu0 %v4174_v32 }
  0x40   :  { %1751 = vmatprep.subr.bf16.mxu0 %v3638_v36  ;;  %v3755_v36 = vld [vmem:[%s5196_s1 + $0x70] ss:$8 sps:$4 sm:$0xff]  }
  0x41   :  { %1380 = vmatpush1.bf16.msra.mxu1 %v3755_v36  ;;  %v3684_v36 = vld [vmem:[%s5195_s0 + $0x194] ss:$28 sps:$4 sm:$0xff]  }
  0x42   :  { %1591 = vmatmul.mubr.bf16.vlgmr.msra.gmra.mrb[0].mxu0 %v3633_v35  ;;  %v3656_v35 = vld [vmem:[%s5195_s0 + $0xb0] ss:$28 sps:$4 sm:$0xff]  }
  0x43   :  { %1752 = vmatpush1.bf16.msra.mxu0 %v3636_v37  ;;  %1600 = vmatprep.mubr.bf16.mxu0 %v3642_v40  ;;  %v3663_v37 = vld [vmem:[%s5195_s0 + $0xec] ss:$28 sps:$4 sm:$0xff]  }
  0x44   :  { %1753 = vmatprep.subr.bf16.mxu0 %v3641_v39  ;;  %v3674_v39 = vld [vmem:[%s5196_s1 + $0x274] ss:$8 sps:$4 sm:$0xff]   ;;  %v3756_v40 = vld [vmem:[%s5196_s1 + $0x84] ss:$8 sps:$4 sm:$0xff]  }
  0x45   :  { %1381 = vmatprep.subr.bf16.mxu1 %v3756_v40  ;;  %v3702_v40 = vld [vmem:[%s5196_s1 + $0x2d0] ss:$8 sps:$4 sm:$0xff]  }
  0x46   :  { %1382 = vmatpush1.bf16.msra.mxu1 %v3758_v41  ;;  %v3710_v41 = vld [vmem:[%s5196_s1 + $0x2e4] ss:$8 sps:$4 sm:$0xff]  }
  0x47   :  { %1754 = vmatpush1.bf16.msra.mxu0 %v3639_v44  ;;  %v3665_v44 = vld [vmem:[%s5195_s0 + $0xe8] ss:$28 sps:$4 sm:$0xff]   ;;  %1383 = vmatprep.subr.bf16.mxu1 %v3761_v43  ;;  %v3788_v43 = vld [vmem:[%s5196_s1 + $0xf4] ss:$8 sps:$4 sm:$0xff]  }
  0x48   :  { %1755 = vmatprep.subr.bf16.mxu0 %v3647_v46  ;;  %v3669_v46 = vld [vmem:[%s5195_s0 + $0x124] ss:$28 sps:$4 sm:$0xff]  }
  0x4a   :  { %1601 = vmatmul.mubr.bf16.gmra.mrb[4].mxu0 %v3644_v47  ;;  %v3678_v47 = vld [vmem:[%s5196_s1 + $0x280] ss:$8 sps:$4 sm:$0xff]  }
  0x4b   :  { %1756 = vmatpush1.bf16.msra.mxu0 %v3645_v49  ;;  %1610 = vmatprep.mubr.bf16.mxu0 %v3648_v50  ;;  %v3683_v49 = vld [vmem:[%s5196_s1 + $0x294] ss:$8 sps:$4 sm:$0xff]   ;;  %v3764_v50 = vld [vmem:[%s5196_s1 + $0x90] ss:$8 sps:$4 sm:$0xff]  }
  0x4c   :  { %1757 = vmatprep.subr.bf16.mxu0 %v3653_v51  ;;  %v3765_v51 = vld [vmem:[%s5196_s1 + $0xa4] ss:$8 sps:$4 sm:$0xff]   ;;  %1384 = vmatpush1.bf16.msra.mxu1 %v3764_v50  ;;  %v3714_v50 = vld [vmem:[%s5196_s1 + $0x2f0] ss:$8 sps:$4 sm:$0xff]  }
  0x4d   :  { %1385 = vmatprep.subr.bf16.mxu1 %v3765_v51  ;;  %v3798_v51 = vld [vmem:[%s5195_s0 + $0x3c] ss:$28 sps:$4 sm:$0xff]  }
  0x4f   :  { %1758 = vmatpush1.bf16.msra.mxu0 %v3651_v54  ;;  %v3767_v54 = vld [vmem:[%s5196_s1 + $0xa0] ss:$8 sps:$4 sm:$0xff]  }
  0x50   :  { %1759 = vmatprep.subr.bf16.mxu0 %v3659_v56  ;;  %v3671_v56 = vld [vmem:[%s5195_s0 + $0x120] ss:$28 sps:$4 sm:$0xff]   ;;  %1386 = vmatpush1.bf16.msra.mxu1 %v3767_v54 }
  0x51   :  { %1387 = vmatprep.subr.bf16.mxu1 %v3770_v55  ;;  %v3696_v54 = vld [vmem:[%s5195_s0 + $0x204] ss:$28 sps:$4 sm:$0xff]   ;;  %v3800_v55 = vld [vmem:[%s5195_s0 + $0x38] ss:$28 sps:$4 sm:$0xff]  }
  0x52   :  { %1611 = vmatmul.mubr.bf16.gmra.mrb[8].mxu0 %v3650_v57  ;;  %v3773_v57 = vld [vmem:[%s5196_s1 + $0xb0] ss:$8 sps:$4 sm:$0xff]  }
  0x53   :  { %1620 = vmatprep.mubr.bf16.mxu0 %v3654_v59  ;;  %1760 = vmatpush1.bf16.msra.mxu0 %v3657_v60  ;;  %v3687_v59 = vld [vmem:[%s5196_s1 + $0x2a0] ss:$8 sps:$4 sm:$0xff]   ;;  %v3695_v60 = vld [vmem:[%s5196_s1 + $0x2b4] ss:$8 sps:$4 sm:$0xff]  }
  0x54   :  { %1761 = vmatprep.subr.bf16.mxu0 %v3662_v61  ;;  %v3774_v61 = vld [vmem:[%s5196_s1 + $0xc4] ss:$8 sps:$4 sm:$0xff]   ;;  %1388 = vmatpush1.bf16.msra.mxu1 %v3773_v57 }
  0x55   :  { %1389 = vmatprep.subr.bf16.mxu1 %v3774_v61 }
  0x57   :  { %1762 = vmatpush1.bf16.msra.mxu0 %v3660_v13  ;;  %v3776_v13 = vld [vmem:[%s5196_s1 + $0xc0] ss:$8 sps:$4 sm:$0xff]  }
  0x58   :  { %1763 = vmatprep.subr.bf16.mxu0 %v3668_v34  ;;  %v3677_v34 = vld [vmem:[%s5195_s0 + $0x158] ss:$28 sps:$4 sm:$0xff]   ;;  %1390 = vmatpush1.bf16.msra.mxu1 %v3776_v13 }
  0x59   :  { %1391 = vmatprep.subr.bf16.mxu1 %v3779_v33 }
  0x5a   :  { %1621 = vmatmul.mubr.bf16.gmra.mrb[12].mxu0 %v3656_v35  ;;  %v3782_v35 = vld [vmem:[%s5196_s1 + $0xd0] ss:$8 sps:$4 sm:$0xff]  }
  0x5b   :  { %1630 = vmatprep.mubr.bf16.mxu0 %v3663_v37  ;;  %1764 = vmatpush1.bf16.msra.mxu0 %v3666_v38  ;;  %v3699_v37 = vld [vmem:[%s5196_s1 + $0x2c0] ss:$8 sps:$4 sm:$0xff]   ;;  %v3704_v38 = vld [vmem:[%s5196_s1 + $0x2d4] ss:$8 sps:$4 sm:$0xff]  }
  0x5c   :  { %1765 = vmatprep.subr.bf16.mxu0 %v3674_v39  ;;  %v3783_v39 = vld [vmem:[%s5196_s1 + $0xe4] ss:$8 sps:$4 sm:$0xff]   ;;  %1392 = vmatpush1.bf16.msra.mxu1 %v3782_v35 }
  0x5d   :  { %1393 = vmatprep.subr.bf16.mxu1 %v3783_v39 }
  0x5f   :  { %1766 = vmatpush1.bf16.msra.mxu0 %v3672_v42  ;;  %v3785_v42 = vld [vmem:[%s5196_s1 + $0xe0] ss:$8 sps:$4 sm:$0xff]  }
  0x60   :  { %1767 = vmatprep.subr.bf16.mxu0 %v3680_v45  ;;  %v3791_v45 = vld [vmem:[%s5196_s1 + $0xf0] ss:$8 sps:$4 sm:$0xff]   ;;  %1394 = vmatpush1.bf16.msra.mxu1 %v3785_v42 }
  0x61   :  { %1395 = vmatprep.subr.bf16.mxu1 %v3788_v43 }
  0x62   :  { %1631 = vmatmul.mubr.bf16.gmra.mrb[16].mxu0 %v3665_v44  ;;  %v3686_v44 = vld [vmem:[%s5195_s0 + $0x190] ss:$28 sps:$4 sm:$0xff]  }
  0x63   :  { %1640 = vmatprep.mubr.bf16.mxu0 %v3669_v46  ;;  %1768 = vmatpush1.bf16.msra.mxu0 %v3678_v47  ;;  %v3690_v46 = vld [vmem:[%s5195_s0 + $0x1cc] ss:$28 sps:$4 sm:$0xff]  }
  0x64   :  { %1769 = vmatprep.subr.bf16.mxu0 %v3683_v49  ;;  %v3708_v47 = vld [vmem:[%s5196_s1 + $0x2e0] ss:$8 sps:$4 sm:$0xff]   ;;  %1396 = vmatpush1.bf16.msra.mxu1 %v3791_v45 }
  0x65   :  { %v3792_v49 = vld [vmem:[%s5195_s0] ss:$28 sps:$4 sm:$0xff]   ;;  %3293 = vmatprep.subr.bf16.mxu1 %v3987_v0  ;;  %v3804_v0 = vld [vmem:[%s5195_s0 + $0x74] ss:$28 sps:$4 sm:$0xff]  }
  0x67   :  { %1770 = vmatpush1.bf16.msra.mxu0 %v3681_v52  ;;  %v3727_v52 = vld [vmem:[%s5196_s1 + $0x304] ss:$8 sps:$4 sm:$0xff]   ;;  %1398 = vmatmul.mubr.bf16.vlgmr.msra.gmra.mrb[0].mxu1 %v3792_v49 }
  0x68   :  { %1771 = vmatprep.subr.bf16.mxu0 %v3689_v53  ;;  %v3692_v53 = vld [vmem:[%s5195_s0 + $0x1c8] ss:$28 sps:$4 sm:$0xff]   ;;  %1407 = vmatprep.mubr.bf16.mxu1 %v3798_v51 }
  0x69   :  { %3309 = vmatpush1.bf16.msra.mxu1 %v3992_v1  ;;  %v3698_v1 = vld [vmem:[%s5195_s0 + $0x200] ss:$28 sps:$4 sm:$0xff]  }
  0x6a   :  { %1641 = vmatmul.mubr.bf16.gmra.mrb[20].mxu0 %v3671_v56  ;;  %3294 = vmatprep.subr.bf16.mxu1 %v3998_v2  ;;  %v3705_v56 = vld [vmem:[%s5195_s0 + $0x23c] ss:$28 sps:$4 sm:$0xff]   ;;  %v3806_v2 = vld [vmem:[%s5195_s0 + $0x70] ss:$28 sps:$4 sm:$0xff]  }
  0x6b   :  { %1650 = vmatprep.mubr.bf16.mxu0 %v3675_v58  ;;  %1772 = vmatpush1.bf16.msra.mxu0 %v3687_v59 }
  0x6c   :  { %1773 = vmatprep.subr.bf16.mxu0 %v3695_v60 }
  0x6d   :  { %3310 = vmatpush1.bf16.msra.mxu1 %v4004_v3  ;;  %v3810_v3 = vld [vmem:[%s5195_s0 + $0xac] ss:$28 sps:$4 sm:$0xff]  }
  0x6e   :  { %3295 = vmatprep.subr.bf16.mxu1 %v4010_v4  ;;  %v3707_v4 = vld [vmem:[%s5195_s0 + $0x238] ss:$28 sps:$4 sm:$0xff]  }
  0x6f   :  { %1774 = vmatpush1.bf16.msra.mxu0 %v3693_v62  ;;  %1408 = vmatmul.mubr.bf16.gmra.mrb[4].mxu1 %v3800_v55 }
  0x70   :  { %1775 = vmatprep.subr.bf16.mxu0 %v3701_v63  ;;  %1417 = vmatprep.mubr.bf16.mxu1 %v3804_v0 }
  0x71   :  { %3311 = vmatpush1.bf16.msra.mxu1 %v4016_v5  ;;  %v3711_v5 = vld [vmem:[%s5195_s0 + $0x274] ss:$28 sps:$4 sm:$0xff]  }
  0x72   :  { %1651 = vmatmul.mubr.bf16.gmra.mrb[24].mxu0 %v3677_v34  ;;  %3296 = vmatprep.subr.bf16.mxu1 %v4022_v6  ;;  %v3812_v6 = vld [vmem:[%s5195_s0 + $0xa8] ss:$28 sps:$4 sm:$0xff]  }
  0x73   :  { %1660 = vmatprep.mubr.bf16.mxu0 %v3684_v36  ;;  %1776 = vmatpush1.bf16.msra.mxu0 %v3699_v37 }
  0x74   :  { %1777 = vmatprep.subr.bf16.mxu0 %v3704_v38 }
  0x75   :  { %3312 = vmatpush1.bf16.msra.mxu1 %v4028_v7  ;;  %v3816_v7 = vld [vmem:[%s5195_s0 + $0xe4] ss:$28 sps:$4 sm:$0xff]  }
  0x76   :  { %3297 = vmatprep.subr.bf16.mxu1 %v4034_v8 }
  0x77   :  { %1778 = vmatpush1.bf16.msra.mxu0 %v3702_v40  ;;  %1418 = vmatmul.mubr.bf16.gmra.mrb[8].mxu1 %v3806_v2 }
  0x78   :  { %1779 = vmatprep.subr.bf16.mxu0 %v3710_v41  ;;  %1427 = vmatprep.mubr.bf16.mxu1 %v3810_v3 }
  0x79   :  { %3313 = vmatpush1.bf16.msra.mxu1 %v4040_v9 }
  0x7a   :  { %1661 = vmatmul.mubr.bf16.gmra.mrb[28].mxu0 %v3686_v44  ;;  %3298 = vmatprep.subr.bf16.mxu1 %v4046_v10 }
  0x7b   :  { %1670 = vmatprep.mubr.bf16.mxu0 %v3690_v46  ;;  %1780 = vmatpush1.bf16.msra.mxu0 %v3708_v47 }
  0x7c   :  { %1781 = vmatprep.subr.bf16.mxu0 %v3716_v48 }
  0x7d   :  { %3314 = vmatpush1.bf16.msra.mxu1 %v4052_v11 }
  0x7e   :  { %3299 = vmatprep.subr.bf16.mxu1 %v4058_v12 }
  0x7f   :  { %1782 = vmatpush1.bf16.msra.mxu0 %v3714_v50 }
  0x80   :  { %1944 = vmatprep.subr.bf16.mxu0 %v3727_v52 }
  0x82   :  { %1671 = vmatmul.mubr.bf16.gmra.mrb[32].mxu0 %v3692_v53 }
  0x83   :  { %1680 = vmatprep.mubr.bf16.mxu0 %v3696_v54 }
  0x8a   :  { %1681 = vmatmul.mubr.bf16.gmra.mrb[36].mxu0 %v3698_v1 }
  0x8b   :  { %1690 = vmatprep.mubr.bf16.mxu0 %v3705_v56 }
  0x92   :  { %1691 = vmatmul.mubr.bf16.gmra.mrb[40].mxu0 %v3707_v4 }
  0x93   :  { %1700 = vmatprep.mubr.bf16.mxu0 %v3711_v5 }
  0x94   :  { %12 = vsyncpa [#allocation3], 0  ;;  %1428 = vmatmul.mubr.bf16.gmra.mrb[12].mxu1 %v3812_v6  ;;  %v3713_v8 = vld [vmem:[%s5195_s0 + $0x270] ss:$28 sps:$4 sm:$0xff]   ;;  %v3818_v10 = vld [vmem:[%s5195_s0 + $0xe0] ss:$28 sps:$4 sm:$0xff]  }
  0x95   :  { %1437 = vmatprep.mubr.bf16.mxu1 %v3816_v7  ;;  %3315 = vmatpush1.bf16.msra.mxu1 %v4067_v14  ;;  %v3722_v9 = vld [vmem:[%s5195_s0 + $0x14] ss:$28 sps:$4 sm:$0xff]   ;;  %v3822_v11 = vld [vmem:[%s5195_s0 + $0x11c] ss:$28 sps:$4 sm:$0xff]   ;;  %v3725_v14 = vld [vmem:[%s5196_s1 + $0x300] ss:$8 sps:$4 sm:$0xff]  }
  0x96   :  { %3300 = vmatprep.subr.bf16.mxu1 %v4073_v15  ;;  %v3720_v12 = vld [vmem:[%s5195_s0 + $0x10] ss:$28 sps:$4 sm:$0xff]   ;;  %v3846_v57 = vld [vmem:[%s5195_s0 + $0x1f8] ss:$28 sps:$4 sm:$0xff]   ;;  %v3772_v58 = vld [vmem:[%s5195_s0 + $0x128] ss:$28 sps:$4 sm:$0xff]  }
  0x97   :  { %v3732_v15 = vld [vmem:[%s5195_s0 + $0x4c] ss:$28 sps:$4 sm:$0xff]   ;;  %v3777_v59 = vld [vmem:[%s5195_s0 + $0x164] ss:$28 sps:$4 sm:$0xff]   ;;  %v3786_v63 = vld [vmem:[%s5195_s0 + $0x19c] ss:$28 sps:$4 sm:$0xff]  }
  0x98   :  { %v3850_v60 = vld [vmem:[%s5195_s0 + $0x230] ss:$28 sps:$4 sm:$0xff]   ;;  %v3781_v62 = vld [vmem:[%s5195_s0 + $0x160] ss:$28 sps:$4 sm:$0xff]   ;;  %v3854_v13 = vld [vmem:[%s5195_s0 + $0x268] ss:$28 sps:$4 sm:$0xff]  }
  0x99   :  { %3316 = vmatpush1.bf16.msra.mxu1 %v4079_v16  ;;  %v3824_v16 = vld [vmem:[%s5195_s0 + $0x118] ss:$28 sps:$4 sm:$0xff]   ;;  %v3852_v61 = vld [vmem:[%s5195_s0 + $0x26c] ss:$28 sps:$4 sm:$0xff]   ;;  %v3856_v33 = vld [vmem:[%s5195_s0 + $0x2a4] ss:$28 sps:$4 sm:$0xff]  }
  0x9a   :  { %1701 = vmatmul.mubr.bf16.gmra.mrb[44].mxu0 %v3713_v8  ;;  %3301 = vmatprep.subr.bf16.mxu1 %v4085_v17  ;;  %v3828_v17 = vld [vmem:[%s5195_s0 + $0x154] ss:$28 sps:$4 sm:$0xff]   ;;  %v3858_v36 = vld [vmem:[%s5195_s0 + $0x2a0] ss:$28 sps:$4 sm:$0xff]   ;;  %v3801_v39 = vld [vmem:[%s5195_s0 + $0x20c] ss:$28 sps:$4 sm:$0xff]  }
  0x9b   :  { %1783 = vmatprep.mubr.bf16.mxu0 %v3722_v9  ;;  %v3790_v34 = vld [vmem:[%s5195_s0 + $0x198] ss:$28 sps:$4 sm:$0xff]   ;;  %v3797_v38 = vld [vmem:[%s5195_s0 + $0x1d0] ss:$28 sps:$4 sm:$0xff]   ;;  %v3803_v42 = vld [vmem:[%s5195_s0 + $0x208] ss:$28 sps:$4 sm:$0xff]  }
  0x9c   :  { %1438 = vmatmul.mubr.bf16.gmra.mrb[16].mxu1 %v3818_v10  ;;  %v3795_v35 = vld [vmem:[%s5195_s0 + $0x1d4] ss:$28 sps:$4 sm:$0xff]   ;;  %v3860_v37 = vld [vmem:[%s5195_s0 + $0x2dc] ss:$28 sps:$4 sm:$0xff]   ;;  %v3807_v43 = vld [vmem:[%s5195_s0 + $0x244] ss:$28 sps:$4 sm:$0xff]  }
  0x9d   :  { %1447 = vmatprep.mubr.bf16.mxu1 %v3822_v11  ;;  %3317 = vmatpush1.bf16.msra.mxu1 %v4091_v18  ;;  %v3736_v18 = vld [vmem:[%s5195_s0 + $0x48] ss:$28 sps:$4 sm:$0xff]   ;;  %v3862_v40 = vld [vmem:[%s5195_s0 + $0x2d8] ss:$28 sps:$4 sm:$0xff]   ;;  %v3866_v44 = vld [vmem:[%s5195_s0 + $0x310] ss:$28 sps:$4 sm:$0xff]  }
  0x9e   :  { %3302 = vmatprep.subr.bf16.mxu1 %v4097_v19  ;;  %v3741_v19 = vld [vmem:[%s5195_s0 + $0x84] ss:$28 sps:$4 sm:$0xff]   ;;  %v3864_v41 = vld [vmem:[%s5195_s0 + $0x314] ss:$28 sps:$4 sm:$0xff]   ;;  %v3868_v45 = vld [vmem:[%s5195_s0 + $0x34c] ss:$28 sps:$4 sm:$0xff]  }
  0x9f   :  { %v3809_v46 = vld [vmem:[%s5195_s0 + $0x240] ss:$28 sps:$4 sm:$0xff]   ;;  %v3870_v48 = vld [vmem:[%s5195_s0 + $0x348] ss:$28 sps:$4 sm:$0xff]   ;;  %v3815_v50 = vld [vmem:[%s5195_s0 + $0x278] ss:$28 sps:$4 sm:$0xff]  }
  0xa0   :  { %v3813_v47 = vld [vmem:[%s5195_s0 + $0x27c] ss:$28 sps:$4 sm:$0xff]   ;;  %v3874_v49 = vld [vmem:[%s5195_s0 + $0x2ac] ss:$28 sps:$4 sm:$0xff]   ;;  %v3819_v51 = vld [vmem:[%s5195_s0 + $0x2b4] ss:$28 sps:$4 sm:$0xff]  }
  0xa1   :  { %3318 = vmatpush1.bf16.msra.mxu1 %v4103_v20  ;;  %v3830_v20 = vld [vmem:[%s5195_s0 + $0x150] ss:$28 sps:$4 sm:$0xff]   ;;  %v3872_v52 = vld [vmem:[%s5195_s0 + $0x2a8] ss:$28 sps:$4 sm:$0xff]   ;;  %v3878_v0 = vld [vmem:[%s5195_s0 + $0x2e0] ss:$28 sps:$4 sm:$0xff]  }
  0xa2   :  { %1784 = vmatmul.mubr.bf16.vlgmr.msra.gmra.mrb[0].mxu0 %v3720_v12  ;;  %3303 = vmatprep.subr.bf16.mxu1 %v4109_v21  ;;  %v3834_v21 = vld [vmem:[%s5195_s0 + $0x18c] ss:$28 sps:$4 sm:$0xff]   ;;  %v3876_v53 = vld [vmem:[%s5195_s0 + $0x2e4] ss:$28 sps:$4 sm:$0xff]   ;;  %v3880_v1 = vld [vmem:[%s5195_s0 + $0x31c] ss:$28 sps:$4 sm:$0xff]  }
  0xa3   :  { %1945 = vmatpush1.bf16.msra.mxu0 %v3725_v14  ;;  %1793 = vmatprep.mubr.bf16.mxu0 %v3732_v15  ;;  %v3821_v54 = vld [vmem:[%s5195_s0 + $0x2b0] ss:$28 sps:$4 sm:$0xff]   ;;  %v3827_v56 = vld [vmem:[%s5195_s0 + $0x2e8] ss:$28 sps:$4 sm:$0xff]   ;;  %v3882_v3 = vld [vmem:[%s5195_s0 + $0x318] ss:$28 sps:$4 sm:$0xff]  }
  0xa4   :  { %1448 = vmatmul.mubr.bf16.gmra.mrb[20].mxu1 %v3824_v16  ;;  %v3825_v55 = vld [vmem:[%s5195_s0 + $0x2ec] ss:$28 sps:$4 sm:$0xff]   ;;  %v3831_v2 = vld [vmem:[%s5195_s0 + $0x324] ss:$28 sps:$4 sm:$0xff]   ;;  %v3884_v4 = vld [vmem:[%s5195_s0 + $0x354] ss:$28 sps:$4 sm:$0xff]  }
  0xa5   :  { %1457 = vmatprep.mubr.bf16.mxu1 %v3828_v17  ;;  %3319 = vmatpush1.bf16.msra.mxu1 %v4115_v22  ;;  %v3745_v22 = vld [vmem:[%s5195_s0 + $0x80] ss:$28 sps:$4 sm:$0xff]   ;;  %v3886_v7 = vld [vmem:[%s5195_s0 + $0x350] ss:$28 sps:$4 sm:$0xff]   ;;  %v3839_v8 = vld [vmem:[%s5195_s0 + $0x358] ss:$28 sps:$4 sm:$0xff]  }
  0xa6   :  { %3304 = vmatprep.subr.bf16.mxu1 %v4121_v23  ;;  %v3750_v23 = vld [vmem:[%s5195_s0 + $0xbc] ss:$28 sps:$4 sm:$0xff]   ;;  %v3892_v9 = vld [vmem:[%s5198_s3 + $0x40] sm:$0xff]   ;;  %v3940_v11 = vmov 0   ;;  %v3894_v12 = vld [vmem:[%s5198_s3 + $0x48] sm:$0xff]   ;;  %vm1316_vm0 = vcmask 130048  }
  0xa7   :  { %v3833_v5 = vld [vmem:[%s5195_s0 + $0x320] ss:$28 sps:$4 sm:$0xff]   ;;  %v3895_v14 = vld [vmem:[%s5198_s3 + $0x8] sm:$0xff]   ;;  %v3843_v15 = vld [vmem:[%s5195_s0 + $0x18] ss:$28 sps:$4 sm:$0xff]  }
  0xa8   :  { %v3837_v6 = vld [vmem:[%s5195_s0 + $0x35c] ss:$28 sps:$4 sm:$0xff]   ;;  %v3893_v10 = vld [vmem:[%s5198_s3] sm:$0xff]   ;;  %v3896_v16 = vld [vmem:[%s5198_s3 + $0x50] sm:$0xff]  }
  0xa9   :  { %3320 = vmatpush1.bf16.msra.mxu1 %v4127_v24  ;;  %v3836_v24 = vld [vmem:[%s5195_s0 + $0x188] ss:$28 sps:$4 sm:$0xff]   ;;  %v3897_v17 = vld [vmem:[%s5198_s3 + $0x10] sm:$0xff]  }
  0xaa   :  { %1794 = vmatmul.mubr.bf16.gmra.mrb[4].mxu0 %v3736_v18  ;;  %3305 = vmatprep.subr.bf16.mxu1 %v4133_v25  ;;  %v3840_v25 = vld [vmem:[%s5195_s0 + $0x1c4] ss:$28 sps:$4 sm:$0xff]   ;;  %v3898_v18 = vld [vmem:[%s5198_s3 + $0x58] sm:$0xff]  }
  0xab   :  { %1803 = vmatprep.mubr.bf16.mxu0 %v3741_v19  ;;  %v3899_v19 = vld [vmem:[%s5198_s3 + $0x18] sm:$0xff]  }
  0xac   :  { %1458 = vmatmul.mubr.bf16.gmra.mrb[24].mxu1 %v3830_v20  ;;  %v3847_v20 = vld [vmem:[%s5195_s0 + $0x50] ss:$28 sps:$4 sm:$0xff]  }
  0xad   :  { %1467 = vmatprep.mubr.bf16.mxu1 %v3834_v21  ;;  %3321 = vmatpush1.bf16.msra.mxu1 %v4139_v26  ;;  %v3754_v26 = vld [vmem:[%s5195_s0 + $0xb8] ss:$28 sps:$4 sm:$0xff]   ;;  %v3900_v21 = vld [vmem:[%s5198_s3 + $0x60] sm:$0xff]  }
  0xae   :  { %3306 = vmatprep.subr.bf16.mxu1 %v4145_v27  ;;  %v3759_v27 = vld [vmem:[%s5195_s0 + $0xf4] ss:$28 sps:$4 sm:$0xff]  }
  0xb1   :  { %3322 = vmatpush1.bf16.msra.mxu1 %v4151_v28  ;;  %v3842_v28 = vld [vmem:[%s5195_s0 + $0x1c0] ss:$28 sps:$4 sm:$0xff]  }
  0xb2   :  { %1804 = vmatmul.mubr.bf16.gmra.mrb[8].mxu0 %v3745_v22  ;;  %3307 = vmatprep.subr.bf16.mxu1 %v4157_v29  ;;  %v3844_v29 = vld [vmem:[%s5195_s0 + $0x1fc] ss:$28 sps:$4 sm:$0xff]   ;;  %v3901_v22 = vld [vmem:[%s5198_s3 + $0x20] sm:$0xff]  }
  0xb3   :  { %1813 = vmatprep.mubr.bf16.mxu0 %v3750_v23  ;;  %v3902_v23 = vld [vmem:[%s5198_s3 + $0x68] sm:$0xff]  }
  0xb4   :  { %1468 = vmatmul.mubr.bf16.gmra.mrb[28].mxu1 %v3836_v24  ;;  %v3851_v24 = vld [vmem:[%s5195_s0 + $0x88] ss:$28 sps:$4 sm:$0xff]  }
  0xb5   :  { %1477 = vmatprep.mubr.bf16.mxu1 %v3840_v25  ;;  %3323 = vmatpush1.bf16.msra.mxu1 %v4163_v30  ;;  %v3763_v30 = vld [vmem:[%s5195_s0 + $0xf0] ss:$28 sps:$4 sm:$0xff]   ;;  %v3855_v25 = vld [vmem:[%s5195_s0 + $0xc0] ss:$28 sps:$4 sm:$0xff]  }
  0xb6   :  { %3308 = vmatprep.subr.bf16.mxu1 %v4169_v31  ;;  %v3768_v31 = vld [vmem:[%s5195_s0 + $0x12c] ss:$28 sps:$4 sm:$0xff]  }
  0xb9   :  { %3324 = vmatpush1.bf16.msra.mxu1 %v4174_v32  ;;  %v3848_v32 = vld [vmem:[%s5195_s0 + $0x234] ss:$28 sps:$4 sm:$0xff]  }
  0xba   :  { %1814 = vmatmul.mubr.bf16.gmra.mrb[12].mxu0 %v3754_v26  ;;  %3109 = vmatprep.subr.bf16.mxu1 %v3892_v9  ;;  %v3859_v26 = vld [vmem:[%s5195_s0 + $0xf8] ss:$28 sps:$4 sm:$0xff]  }
  0xbb   :  { %1823 = vmatprep.mubr.bf16.mxu0 %v3759_v27  ;;  %v3863_v27 = vld [vmem:[%s5195_s0 + $0x130] ss:$28 sps:$4 sm:$0xff]  }
  0xbc   :  { %1478 = vmatmul.mubr.bf16.gmra.mrb[32].mxu1 %v3842_v28  ;;  %v3867_v28 = vld [vmem:[%s5195_s0 + $0x168] ss:$28 sps:$4 sm:$0xff]  }
  0xbd   :  { %1487 = vmatprep.mubr.bf16.mxu1 %v3844_v29 }
  0xc2   :  { %1824 = vmatmul.mubr.bf16.gmra.mrb[16].mxu0 %v3763_v30 }
  0xc3   :  { %1833 = vmatprep.mubr.bf16.mxu0 %v3768_v31 }
  0xc4   :  { %1488 = vmatmul.mubr.bf16.gmra.mrb[36].mxu1 %v3846_v57 }
  0xc5   :  { %1497 = vmatprep.mubr.bf16.mxu1 %v3848_v32  ;;  %v3871_v32 = vld [vmem:[%s5195_s0 + $0x1a0] ss:$28 sps:$4 sm:$0xff]  }
  0xca   :  { %1834 = vmatmul.mubr.bf16.gmra.mrb[20].mxu0 %v3772_v58 }
  0xcb   :  { %1843 = vmatprep.mubr.bf16.mxu0 %v3777_v59 }
  0xcc   :  { %1498 = vmatmul.mubr.bf16.gmra.mrb[40].mxu1 %v3850_v60 }
  0xcd   :  { %1507 = vmatprep.mubr.bf16.mxu1 %v3852_v61 }
  0xd2   :  { %1844 = vmatmul.mubr.bf16.gmra.mrb[24].mxu0 %v3781_v62  ;;  %v3875_v62 = vld [vmem:[%s5195_s0 + $0x1d8] ss:$28 sps:$4 sm:$0xff]  }
  0xd3   :  { %1853 = vmatprep.mubr.bf16.mxu0 %v3786_v63 }
  0xd4   :  { %1508 = vmatmul.mubr.bf16.gmra.mrb[44].mxu1 %v3854_v13 }
  0xd5   :  { %1517 = vmatprep.mubr.bf16.mxu1 %v3856_v33 }
  0xda   :  { %1854 = vmatmul.mubr.bf16.gmra.mrb[28].mxu0 %v3790_v34 }
  0xdb   :  { %1863 = vmatprep.mubr.bf16.mxu0 %v3795_v35  ;;  %v3879_v35 = vld [vmem:[%s5195_s0 + $0x210] ss:$28 sps:$4 sm:$0xff]  }
  0xdc   :  { %1518 = vmatmul.mubr.bf16.gmra.mrb[48].mxu1 %v3858_v36 }
  0xdd   :  { %1527 = vmatprep.mubr.bf16.mxu1 %v3860_v37 }
  0xe2   :  { %1864 = vmatmul.mubr.bf16.gmra.mrb[32].mxu0 %v3797_v38 }
  0xe3   :  { %1873 = vmatprep.mubr.bf16.mxu0 %v3801_v39 }
  0xe4   :  { %1528 = vmatmul.mubr.bf16.gmra.mrb[52].mxu1 %v3862_v40  ;;  %v3883_v40 = vld [vmem:[%s5195_s0 + $0x248] ss:$28 sps:$4 sm:$0xff]  }
  0xe5   :  { %1537 = vmatprep.mubr.bf16.mxu1 %v3864_v41 }
  0xea   :  { %1874 = vmatmul.mubr.bf16.gmra.mrb[36].mxu0 %v3803_v42 }
  0xeb   :  { %1883 = vmatprep.mubr.bf16.mxu0 %v3807_v43 }
  0xec   :  { %1538 = vmatmul.mubr.bf16.gmra.mrb[56].mxu1 %v3866_v44 }
  0xed   :  { %1547 = vmatprep.mubr.bf16.mxu1 %v3868_v45  ;;  %v3903_v45 = vld [vmem:[%s5198_s3 + $0x28] sm:$0xff]  }
  0xf2   :  { %1884 = vmatmul.mubr.bf16.gmra.mrb[40].mxu0 %v3809_v46  ;;  %v3887_v46 = vld [vmem:[%s5195_s0 + $0x280] ss:$28 sps:$4 sm:$0xff]  }
  0xf3   :  { %1893 = vmatprep.mubr.bf16.mxu0 %v3813_v47  ;;  %v3904_v47 = vld [vmem:[%s5198_s3 + $0x70] sm:$0xff]  }
  0xf4   :  { %1548 = vmatmul.mubr.bf16.gmra.mrb[60].mxu1 %v3870_v48  ;;  %v3905_v48 = vld [vmem:[%s5198_s3 + $0x30] sm:$0xff]  }
  0xf5   :  { %1710 = vmatprep.mubr.bf16.mxu1 %v3874_v49 }
  0xfa   :  { %1894 = vmatmul.mubr.bf16.gmra.mrb[44].mxu0 %v3815_v50 }
  0xfb   :  { %1903 = vmatprep.mubr.bf16.mxu0 %v3819_v51 }
  0xfc   :  { %1711 = vmatmul.mubr.bf16.vlgmr.msra.gmra.mrb[48].mxu1 %v3872_v52  ;;  %v3906_v52 = vld [vmem:[%s5198_s3 + $0x78] sm:$0xff]  }
  0xfd   :  { %1720 = vmatprep.mubr.bf16.mxu1 %v3876_v53  ;;  %3110 = vmatpush3.bf16.msra.mxu1 %v3893_v10 }
  0xfe   :  { %3111 = vmatprep.subr.bf16.mxu1 %v3894_v12 }
 0x101   :  { %3112 = vmatpush3.bf16.msra.mxu1 %v3895_v14 }
 0x102   :  { %1904 = vmatmul.mubr.bf16.gmra.mrb[48].mxu0 %v3821_v54  ;;  %3113 = vmatprep.subr.bf16.mxu1 %v3896_v16  ;;  %v3907_v54 = vld [vmem:[%s5198_s3 + $0x38] sm:$0xff]  }
 0x103   :  { %1913 = vmatprep.mubr.bf16.mxu0 %v3825_v55  ;;  %v3888_v55 = vld [vmem:[%s5195_s0 + $0x2b8] ss:$28 sps:$4 sm:$0xff]  }
 0x104   :  { %1721 = vmatmul.mubr.bf16.gmra.mrb[52].mxu1 %v3878_v0 }
 0x105   :  { %1730 = vmatprep.mubr.bf16.mxu1 %v3880_v1  ;;  %3114 = vmatpush3.bf16.msra.mxu1 %v3897_v17 }
 0x106   :  { %3115 = vmatprep.subr.bf16.mxu1 %v3898_v18 }
 0x109   :  { %3116 = vmatpush3.bf16.msra.mxu1 %v3899_v19 }
 0x10a   :  { %1914 = vmatmul.mubr.bf16.gmra.mrb[52].mxu0 %v3827_v56  ;;  %3117 = vmatprep.subr.bf16.mxu1 %v3900_v21 }
 0x10b   :  { %1923 = vmatprep.mubr.bf16.mxu0 %v3831_v2 }
 0x10c   :  { %1731 = vmatmul.mubr.bf16.gmra.mrb[56].mxu1 %v3882_v3  ;;  %v3889_v3 = vld [vmem:[%s5195_s0 + $0x2f0] ss:$28 sps:$4 sm:$0xff]  }
 0x10d   :  { %1740 = vmatprep.mubr.bf16.mxu1 %v3884_v4  ;;  %3118 = vmatpush3.bf16.msra.mxu1 %v3901_v22 }
 0x10e   :  { %3119 = vmatprep.subr.bf16.mxu1 %v3902_v23 }
 0x111   :  { %3120 = vmatpush3.bf16.msra.mxu1 %v3903_v45 }
 0x112   :  { %1924 = vmatmul.mubr.bf16.gmra.mrb[56].mxu0 %v3833_v5  ;;  %3121 = vmatprep.subr.bf16.mxu1 %v3904_v47 }
 0x113   :  { %1933 = vmatprep.mubr.bf16.mxu0 %v3837_v6 }
 0x114   :  { %1741 = vmatmul.mubr.bf16.gmra.mrb[60].mxu1 %v3886_v7 }
 0x115   :  { %3122 = vmatpush3.bf16.msra.mxu1 %v3905_v48 }
 0x116   :  { %3123 = vmatprep.subr.bf16.mxu1 %v3906_v52 }
 0x119   :  { %3124 = vmatpush3.bf16.msra.mxu1 %v3907_v54 }
 0x11a   :  { %1934 = vmatmul.mubr.bf16.gmra.mrb[60].mxu0 %v3839_v8  ;;  %v3890_v8 = vld [vmem:[%s5195_s0 + $0x328] ss:$28 sps:$4 sm:$0xff]  }
 0x11b   :  { %1976 = vmatprep.mubr.bf16.mxu0 %v3940_v11 }
 0x122   :  { %3067 = vmatmul.mubr.msk.bf16.vlgmr.msra.gmra.mrb[0].mxu0 %vm1316_vm0, %v3843_v15  ;;  %v3891_v15 = vld [vmem:[%s5195_s0 + $0x360] ss:$28 sps:$4 sm:$0xff]  }
 0x123   :  { %1986 = vmatprep.mubr.bf16.mxu0 %v3940_v11 }
 0x12a   :  { %3068 = vmatmul.mubr.msk.bf16.gmra.mrb[4].mxu0 %vm1316_vm0, %v3847_v20 }
 0x12b   :  { %1996 = vmatprep.mubr.bf16.mxu0 %v3940_v11 }
 0x132   :  { %3069 = vmatmul.mubr.msk.bf16.gmra.mrb[8].mxu0 %vm1316_vm0, %v3851_v24 }
 0x133   :  { %2006 = vmatprep.mubr.bf16.mxu0 %v3940_v11 }
 0x13a   :  { %3070 = vmatmul.mubr.msk.bf16.gmra.mrb[12].mxu0 %vm1316_vm0, %v3855_v25  ;;  %v4761_v29 = vpop.f32.mrb[0].mxu1 }
 0x13b   :  { %2016 = vmatprep.mubr.bf16.mxu0 %v3940_v11  ;;  %v4763_v30 = vpop.f32.mrb[1].mxu1 }
 0x13c   :  { %v4766_v31 = vpop.f32.mrb[2].mxu1 }
 0x13d   :  { %v4769_v57 = vpop.f32.mrb[3].mxu1 }
 0x142   :  { %3071 = vmatmul.mubr.msk.bf16.gmra.mrb[16].mxu0 %vm1316_vm0, %v3859_v26  ;;  %v4774_v58 = vpop.f32.mrb[4].mxu1 }
 0x143   :  { %2026 = vmatprep.mubr.bf16.mxu0 %v3940_v11  ;;  %v4776_v59 = vpop.f32.mrb[5].mxu1 }
 0x144   :  { %v4779_v60 = vpop.f32.mrb[6].mxu1 }
 0x145   :  { %v4782_v61 = vpop.f32.mrb[7].mxu1 }
 0x14a   :  { %3072 = vmatmul.mubr.msk.bf16.gmra.mrb[20].mxu0 %vm1316_vm0, %v3863_v27  ;;  %v4787_v63 = vpop.f32.mrb[8].mxu1 }
 0x14b   :  { %2036 = vmatprep.mubr.bf16.mxu0 %v3940_v11  ;;  %v4789_v13 = vpop.f32.mrb[9].mxu1 }
 0x14c   :  { %v4792_v33 = vpop.f32.mrb[10].mxu1 }
 0x14d   :  { %v4795_v34 = vpop.f32.mrb[11].mxu1 }
 0x152   :  { %3073 = vmatmul.mubr.msk.bf16.gmra.mrb[24].mxu0 %vm1316_vm0, %v3867_v28 }
 0x153   :  { %2046 = vmatprep.mubr.bf16.mxu0 %v3940_v11 }
 0x15a   :  { %3074 = vmatmul.mubr.msk.bf16.gmra.mrb[28].mxu0 %vm1316_vm0, %v3871_v32 }
 0x15b   :  { %2056 = vmatprep.mubr.bf16.mxu0 %v3940_v11 }
 0x162   :  { %3075 = vmatmul.mubr.msk.bf16.gmra.mrb[32].mxu0 %vm1316_vm0, %v3875_v62 }
 0x163   :  { %2066 = vmatprep.mubr.bf16.mxu0 %v3940_v11 }
 0x167   :  { %v4800_v36 = vpop.f32.mrb[12].mxu1 }
 0x168   :  { %v4802_v37 = vpop.f32.mrb[13].mxu1 }
 0x169   :  { %v4805_v38 = vpop.f32.mrb[14].mxu1 }
 0x16a   :  { %3076 = vmatmul.mubr.msk.bf16.gmra.mrb[36].mxu0 %vm1316_vm0, %v3879_v35  ;;  %v4808_v39 = vpop.f32.mrb[15].mxu1 }
 0x16b   :  { %2076 = vmatprep.mubr.bf16.mxu0 %v3940_v11 }
 0x16f   :  { %v4813_v41 = vpop.f32.mrb[16].mxu1 }
 0x170   :  { %v4815_v42 = vpop.f32.mrb[17].mxu1 }
 0x171   :  { %v4818_v43 = vpop.f32.mrb[18].mxu1 }
 0x172   :  { %3077 = vmatmul.mubr.msk.bf16.gmra.mrb[40].mxu0 %vm1316_vm0, %v3883_v40  ;;  %v4821_v44 = vpop.f32.mrb[19].mxu1 }
 0x173   :  { %2086 = vmatprep.mubr.bf16.mxu0 %v3940_v11 }
 0x177   :  { %v4835_v49 = vpop.f32.mrb[20].mxu1 }
 0x178   :  { %v4837_v50 = vpop.f32.mrb[21].mxu1 }
 0x179   :  { %v4840_v51 = vpop.f32.mrb[22].mxu1 }
 0x17a   :  { %3078 = vmatmul.mubr.msk.bf16.gmra.mrb[44].mxu0 %vm1316_vm0, %v3887_v46  ;;  %v4846_v53 = vpop.f32.mrb[23].mxu1 }
 0x17b   :  { %2096 = vmatprep.mubr.bf16.mxu0 %v3940_v11 }
 0x17f   :  { %v4854_v0 = vpop.f32.mrb[24].mxu1 }
 0x180   :  { %v4856_v1 = vpop.f32.mrb[25].mxu1 }
 0x181   :  { %v4859_v56 = vpop.f32.mrb[26].mxu1 }
 0x182   :  { %3079 = vmatmul.mubr.msk.bf16.gmra.mrb[48].mxu0 %vm1316_vm0, %v3888_v55  ;;  %v4862_v2 = vpop.f32.mrb[27].mxu1  ;;  %v256_v55 = vlaneseq }
 0x183   :  { %2106 = vmatprep.mubr.bf16.mxu0 %v3940_v11 }
 0x187   :  { %v4867_v4 = vpop.f32.mrb[28].mxu1 }
 0x188   :  { %v4869_v5 = vpop.f32.mrb[29].mxu1 }
 0x189   :  { %v4872_v6 = vpop.f32.mrb[30].mxu1 }
 0x18a   :  { %3080 = vmatmul.mubr.msk.bf16.gmra.mrb[52].mxu0 %vm1316_vm0, %v3889_v3  ;;  %v4875_v7 = vpop.f32.mrb[31].mxu1  ;;  %v257_v3 = vshrl.u32 %v256_v55, 7 }
 0x18b   :  { %2116 = vmatprep.mubr.bf16.mxu0 %v3940_v11 }
 0x18f   :  { %v4880_v9 = vpop.f32.mrb[32].mxu1 }
 0x190   :  { %v4882_v10 = vpop.f32.mrb[33].mxu1 }
 0x191   :  { %v4885_v12 = vpop.f32.mrb[34].mxu1 }
 0x192   :  { %3081 = vmatmul.mubr.msk.bf16.gmra.mrb[56].mxu0 %vm1316_vm0, %v3890_v8  ;;  %v4888_v14 = vpop.f32.mrb[35].mxu1 }
 0x193   :  { %2126 = vmatprep.mubr.bf16.mxu0 %v3940_v11 }
 0x197   :  { %v4893_v16 = vpop.f32.mrb[36].mxu1 }
 0x198   :  { %v4895_v17 = vpop.f32.mrb[37].mxu1 }
 0x199   :  { %v4898_v18 = vpop.f32.mrb[38].mxu1 }
 0x19a   :  { %3082 = vmatmul.mubr.msk.bf16.gmra.mrb[60].mxu0 %vm1316_vm0, %v3891_v15  ;;  %v4900_v19 = vpop.f32.mrb[39].mxu1 }
 0x19f   :  { %v4902_v20 = vpop.f32.mrb[40].mxu1 }
 0x1a0   :  { %v4904_v21 = vpop.f32.mrb[41].mxu1 }
 0x1a1   :  { %v4906_v11 = vpop.f32.mrb[42].mxu1 }
 0x1a2   :  { %v4908_v22 = vpop.f32.mrb[43].mxu1 }
 0x1a7   :  { %v4910_v23 = vpop.f32.mrb[44].mxu1 }
 0x1a8   :  { %v4912_v24 = vpop.f32.mrb[45].mxu1 }
 0x1a9   :  { %v4914_v25 = vpop.f32.mrb[46].mxu1 }
 0x1aa   :  { %v4916_v26 = vpop.f32.mrb[47].mxu1 }
 0x1ab   :  { %5203 = vst [vmem:[#allocation5_spill] sm:$0xff] %v4916_v26 }
 0x1cf   :  { %v4918_v27 = vpop.f32.mrb[48].mxu1 }
 0x1d0   :  { %5204 = vst [vmem:[#allocation6_spill] sm:$0xff] %v4918_v27  ;;  %v4920_v28 = vpop.f32.mrb[49].mxu1 }
 0x1d1   :  { %5205 = vst [vmem:[#allocation7_spill] sm:$0xff] %v4920_v28  ;;  %v4922_v32 = vpop.f32.mrb[50].mxu1 }
 0x1d2   :  { %5206 = vst [vmem:[#allocation8_spill] sm:$0xff] %v4922_v32  ;;  %v4924_v62 = vpop.f32.mrb[51].mxu1 }
 0x1d3   :  { %5207 = vst [vmem:[#allocation9_spill] sm:$0xff] %v4924_v62 }
 0x1d7   :  { %v4926_v35 = vpop.f32.mrb[52].mxu1 }
 0x1d8   :  { %5208 = vst [vmem:[#allocation10_spill] sm:$0xff] %v4926_v35  ;;  %v4928_v40 = vpop.f32.mrb[53].mxu1 }
 0x1d9   :  { %5209 = vst [vmem:[#allocation11_spill] sm:$0xff] %v4928_v40  ;;  %v4930_v45 = vpop.f32.mrb[54].mxu1 }
 0x1da   :  { %5210 = vst [vmem:[#allocation12_spill] sm:$0xff] %v4930_v45  ;;  %v4932_v46 = vpop.f32.mrb[55].mxu1  ;;  %v258_v45 = vsub.s32 0, %v257_v3 }
 0x1db   :  { %5211 = vst [vmem:[#allocation13_spill] sm:$0xff] %v4932_v46 }
 0x1df   :  { %v4934_v47 = vpop.f32.mrb[56].mxu1 }
 0x1e0   :  { %5212 = vst [vmem:[#allocation14_spill] sm:$0xff] %v4934_v47  ;;  %v4936_v48 = vpop.f32.mrb[57].mxu1  ;;  %v254_v47 = vld [vmem:[%s5197_s2] sm:$0x3] }
 0x1e1   :  { %5213 = vst [vmem:[#allocation15_spill] sm:$0xff] %v4936_v48  ;;  %v4938_v52 = vpop.f32.mrb[58].mxu1  ;;  %v262_v48 = vsub.s32 1, %v257_v3  ;;  %v4953_v46 = vrot.slane %v254_v47, %v258_v45 }
 0x1e2   :  { %5214 = vst [vmem:[#allocation16_spill] sm:$0xff] %v4938_v52  ;;  %v4940_v54 = vpop.f32.mrb[59].mxu1 }
 0x1e3   :  { %5215 = vst [vmem:[#allocation17_spill] sm:$0xff] %v4940_v54  ;;  %v4955_v52 = vrot.slane %v254_v47, %v262_v48  ;;  %v1400_v55 = vadd.f32 %v4761_v29, %v4953_v46  ;;  %v3908_v29 = vld [vmem:[%s5200_s5] sm:$0xff]  }
 0x1e4   :  { %3245 = vmatprep.subr.bf16.mxu1 %v3908_v29 }
 0x1e5   :  { %v1406_v62 = vadd.f32 %v4769_v57, %v4955_v52  ;;  %v1412_v57 = vadd.f32 %v4776_v59, %v4955_v52 }
 0x1e7   :  { %v4942_v8 = vpop.f32.mrb[60].mxu1 }
 0x1e8   :  { %5216 = vst [vmem:[#allocation18_spill] sm:$0xff] %v4942_v8  ;;  %v4944_v15 = vpop.f32.mrb[61].mxu1 }
 0x1e9   :  { %5217 = vst [vmem:[#allocation19_spill] sm:$0xff] %v4944_v15  ;;  %v4946_v35 = vpop.f32.mrb[62].mxu1  ;;  %v1402_v15 = vadd.f32 %v4763_v30, %v4955_v52 }
 0x1ea   :  { %5218 = vst [vmem:[#allocation20_spill] sm:$0xff] %v4946_v35  ;;  %v4948_v40 = vpop.f32.mrb[63].mxu1 }
 0x1eb   :  { %5219 = vst [vmem:[#allocation21_spill] sm:$0xff] %v4948_v40  ;;  %v1404_v40 = vadd.f32 %v4766_v31, %v4953_v46  ;;  %v1410_v31 = vadd.f32 %v4774_v58, %v4953_v46 }
 0x1f5   :  { %v1978_v8 = vpop.f32.mrb[0].mxu0 }
 0x1f6   :  { %v3326_v35 = vadd.f32 %v1978_v8, %v1400_v55  ;;  %v1980_v54 = vpop.f32.mrb[1].mxu0 }
 0x1f7   :  { %v3328_v3 = vadd.f32 %v1980_v54, %v1402_v15  ;;  %v1982_v45 = vpop.f32.mrb[2].mxu0  ;;  %v1414_v15 = vadd.f32 %v4779_v60, %v4953_v46  ;;  %v3910_v60 = vld [vmem:[%s5200_s5 + $0x10] sm:$0xff]  }
 0x1f8   :  { %v3330_v32 = vadd.f32 %v1982_v45, %v1404_v40  ;;  %v1984_v47 = vpop.f32.mrb[3].mxu0  ;;  %v2137_v28 = vmax.f32 %v3326_v35, 0.0 }
 0x1f9   :  { %v3332_v48 = vadd.f32 %v1984_v47, %v1406_v62  ;;  %v2138_v27 = vmax.f32 %v3328_v3, 0.0  ;;  %v1416_v62 = vadd.f32 %v4782_v61, %v4955_v52  ;;  %v1420_v61 = vadd.f32 %v4787_v63, %v4953_v46 }
 0x1fa   :  { %v2139_v30 = vmax.f32 %v3330_v32, 0.0  ;;  %v3909_v32 = vld [vmem:[%s5200_s5 + $0x8] sm:$0xff]   ;;  %v1426_v63 = vadd.f32 %v4795_v34, %v4955_v52  ;;  %v1432_v34 = vadd.f32 %v4802_v37, %v4955_v52 }
 0x1fb   :  { %v2140_v26 = vmax.f32 %v3332_v48, 0.0 }
 0x1fc   :  { %v2201_v8 = vpack.c.bf16 %v2139_v30, %v2137_v28 }
 0x1fd   :  { %v2202_v54 = vpack.c.bf16 %v2140_v26, %v2138_v27  ;;  %v1988_v40 = vpop.f32.mrb[4].mxu0 }
 0x1fe   :  { %v3334_v55 = vadd.f32 %v1988_v40, %v1410_v31  ;;  %v1990_v45 = vpop.f32.mrb[5].mxu0  ;;  %v1422_v31 = vadd.f32 %v4789_v13, %v4955_v52 }
 0x1ff   :  { %v3336_v35 = vadd.f32 %v1990_v45, %v1412_v57  ;;  %v1992_v58 = vpop.f32.mrb[6].mxu0  ;;  %2400 = vmatprep.mubr.bf16.mxu1 %v2202_v54 }
 0x200   :  { %v3338_v28 = vadd.f32 %v1992_v58, %v1414_v15  ;;  %v1994_v3 = vpop.f32.mrb[7].mxu0  ;;  %2401 = vmatmul.mubr.bf16.vlgmr.msra.gmra.mrb[64].mxu1 %v2201_v8  ;;  %v2141_v26 = vmax.f32 %v3334_v55, 0.0  ;;  %v3911_v15 = vld [vmem:[%s5200_s5 + $0x18] sm:$0xff]  }
 0x201   :  { %v3340_v59 = vadd.f32 %v1994_v3, %v1416_v62  ;;  %3246 = vmatpush3.bf16.msra.mxu1 %v3908_v29  ;;  %v2142_v47 = vmax.f32 %v3336_v35, 0.0  ;;  %v1424_v29 = vadd.f32 %v4792_v33, %v4953_v46  ;;  %v1430_v3 = vadd.f32 %v4800_v36, %v4953_v46 }
 0x202   :  { %v2143_v27 = vmax.f32 %v3338_v28, 0.0  ;;  %3247 = vmatprep.subr.bf16.mxu1 %v3909_v32 }
 0x203   :  { %v2144_v48 = vmax.f32 %v3340_v59, 0.0 }
 0x204   :  { %v2203_v30 = vpack.c.bf16 %v2143_v27, %v2141_v26 }
 0x205   :  { %v2204_v57 = vpack.c.bf16 %v2144_v48, %v2142_v47  ;;  %v1998_v8 = vpop.f32.mrb[8].mxu0  ;;  %3248 = vmatpush3.bf16.msra.mxu1 %v3909_v32  ;;  %v1434_v47 = vadd.f32 %v4805_v38, %v4953_v46 }
 0x206   :  { %v3342_v54 = vadd.f32 %v1998_v8, %v1420_v61  ;;  %v2000_v40 = vpop.f32.mrb[9].mxu0  ;;  %3249 = vmatprep.subr.bf16.mxu1 %v3910_v60  ;;  %v1436_v61 = vadd.f32 %v4808_v39, %v4955_v52 }
 0x207   :  { %v3344_v55 = vadd.f32 %v2000_v40, %v1422_v31  ;;  %v2002_v45 = vpop.f32.mrb[10].mxu0  ;;  %2408 = vmatprep.mubr.bf16.mxu1 %v2204_v57 }
 0x208   :  { %v3346_v13 = vadd.f32 %v2002_v45, %v1424_v29  ;;  %v2004_v62 = vpop.f32.mrb[11].mxu0  ;;  %2409 = vmatmul.mubr.bf16.gmra.mrb[68].mxu1 %v2203_v30  ;;  %v2145_v35 = vmax.f32 %v3342_v54, 0.0  ;;  %v1444_v45 = vadd.f32 %v4818_v43, %v4953_v46 }
 0x209   :  { %v3348_v32 = vadd.f32 %v2004_v62, %v1426_v63  ;;  %3250 = vmatpush3.bf16.msra.mxu1 %v3910_v60  ;;  %v2146_v58 = vmax.f32 %v3344_v55, 0.0  ;;  %v1442_v63 = vadd.f32 %v4815_v42, %v4955_v52 }
 0x20a   :  { %v2147_v33 = vmax.f32 %v3346_v13, 0.0  ;;  %3251 = vmatprep.subr.bf16.mxu1 %v3911_v15 }
 0x20b   :  { %v2148_v28 = vmax.f32 %v3348_v32, 0.0  ;;  %v1446_v32 = vadd.f32 %v4821_v44, %v4955_v52 }
 0x20c   :  { %v2205_v59 = vpack.c.bf16 %v2147_v33, %v2145_v35 }
 0x20d   :  { %v2206_v26 = vpack.c.bf16 %v2148_v28, %v2146_v58  ;;  %v2008_v27 = vpop.f32.mrb[12].mxu0  ;;  %3252 = vmatpush3.bf16.msra.mxu1 %v3911_v15  ;;  %v1440_v15 = vadd.f32 %v4813_v41, %v4953_v46 }
 0x20e   :  { %v3350_v48 = vadd.f32 %v2008_v27, %v1430_v3  ;;  %v2010_v60 = vpop.f32.mrb[13].mxu0  ;;  %v1452_v27 = vadd.f32 %v4837_v50, %v4955_v52 }
 0x20f   :  { %v3352_v30 = vadd.f32 %v2010_v60, %v1432_v34  ;;  %v2012_v31 = vpop.f32.mrb[14].mxu0  ;;  %2416 = vmatprep.mubr.bf16.mxu1 %v2206_v26  ;;  %v1450_v26 = vadd.f32 %v4835_v49, %v4953_v46 }
 0x210   :  { %v3354_v57 = vadd.f32 %v2012_v31, %v1434_v47  ;;  %v2014_v36 = vpop.f32.mrb[15].mxu0  ;;  %2417 = vmatmul.mubr.bf16.gmra.mrb[72].mxu1 %v2205_v59  ;;  %v2149_v29 = vmax.f32 %v3350_v48, 0.0  ;;  %v1454_v48 = vadd.f32 %v4840_v51, %v4953_v46 }
 0x211   :  { %v3356_v8 = vadd.f32 %v2014_v36, %v1436_v61  ;;  %v2150_v54 = vmax.f32 %v3352_v30, 0.0  ;;  %v1456_v30 = vadd.f32 %v4846_v53, %v4955_v52 }
 0x212   :  { %v2151_v37 = vmax.f32 %v3354_v57, 0.0 }
 0x213   :  { %v2152_v40 = vmax.f32 %v3356_v8, 0.0 }
 0x214   :  { %v2207_v38 = vpack.c.bf16 %v2151_v37, %v2149_v29 }
 0x215   :  { %v2208_v55 = vpack.c.bf16 %v2152_v40, %v2150_v54  ;;  %v2018_v39 = vpop.f32.mrb[16].mxu0  ;;  %v1460_v40 = vadd.f32 %v4854_v0, %v4953_v46 }
 0x216   :  { %v3358_v13 = vadd.f32 %v2018_v39, %v1440_v15  ;;  %v2020_v62 = vpop.f32.mrb[17].mxu0  ;;  %v1462_v15 = vadd.f32 %v4856_v1, %v4955_v52 }
 0x217   :  { %v3360_v35 = vadd.f32 %v2020_v62, %v1442_v63  ;;  %v2022_v33 = vpop.f32.mrb[18].mxu0  ;;  %2424 = vmatprep.mubr.bf16.mxu1 %v2208_v55  ;;  %v1464_v63 = vadd.f32 %v4859_v56, %v4953_v46 }
 0x218   :  { %v3362_v58 = vadd.f32 %v2022_v33, %v1444_v45  ;;  %v2024_v28 = vpop.f32.mrb[19].mxu0  ;;  %2425 = vmatmul.mubr.bf16.gmra.mrb[76].mxu1 %v2207_v38  ;;  %v2153_v3 = vmax.f32 %v3358_v13, 0.0  ;;  %v1466_v45 = vadd.f32 %v4862_v2, %v4955_v52 }
 0x219   :  { %v3364_v41 = vadd.f32 %v2024_v28, %v1446_v32  ;;  %v2154_v42 = vmax.f32 %v3360_v35, 0.0 }
 0x21a   :  { %v2155_v59 = vmax.f32 %v3362_v58, 0.0 }
 0x21b   :  { %v2156_v34 = vmax.f32 %v3364_v41, 0.0  ;;  %v1470_v41 = vadd.f32 %v4867_v4, %v4953_v46 }
 0x21c   :  { %v2209_v43 = vpack.c.bf16 %v2155_v59, %v2153_v3  ;;  %v1472_v3 = vadd.f32 %v4869_v5, %v4955_v52 }
 0x21d   :  { %v2210_v47 = vpack.c.bf16 %v2156_v34, %v2154_v42  ;;  %v2028_v44 = vpop.f32.mrb[20].mxu0  ;;  %v1474_v42 = vadd.f32 %v4872_v6, %v4953_v46 }
 0x21e   :  { %v3366_v60 = vadd.f32 %v2028_v44, %v1450_v26  ;;  %v2030_v61 = vpop.f32.mrb[21].mxu0 }
 0x21f   :  { %v3368_v31 = vadd.f32 %v2030_v61, %v1452_v27  ;;  %v2032_v57 = vpop.f32.mrb[22].mxu0  ;;  %2432 = vmatprep.mubr.bf16.mxu1 %v2210_v47 }
 0x220   :  { %v3370_v36 = vadd.f32 %v2032_v57, %v1454_v48  ;;  %v2034_v8 = vpop.f32.mrb[23].mxu0  ;;  %2433 = vmatmul.mubr.bf16.gmra.mrb[80].mxu1 %v2209_v43  ;;  %v2157_v29 = vmax.f32 %v3366_v60, 0.0  ;;  %v1476_v43 = vadd.f32 %v4875_v7, %v4955_v52  ;;  %v1482_v57 = vadd.f32 %v4882_v10, %v4955_v52 }
 0x221   :  { %v3372_v49 = vadd.f32 %v2034_v8, %v1456_v30  ;;  %v2158_v50 = vmax.f32 %v3368_v31, 0.0  ;;  %v1480_v31 = vadd.f32 %v4880_v9, %v4953_v46  ;;  %v1484_v8 = vadd.f32 %v4885_v12, %v4953_v46 }
 0x222   :  { %v2159_v37 = vmax.f32 %v3370_v36, 0.0 }
 0x223   :  { %v2160_v54 = vmax.f32 %v3372_v49, 0.0 }
 0x224   :  { %v2211_v51 = vpack.c.bf16 %v2159_v37, %v2157_v29  ;;  %v1486_v37 = vadd.f32 %v4888_v14, %v4955_v52 }
 0x225   :  { %v2212_v38 = vpack.c.bf16 %v2160_v54, %v2158_v50  ;;  %v2038_v53 = vpop.f32.mrb[24].mxu0 }
 0x226   :  { %v3374_v55 = vadd.f32 %v2038_v53, %v1460_v40  ;;  %v2040_v39 = vpop.f32.mrb[25].mxu0 }
 0x227   :  { %v3376_v13 = vadd.f32 %v2040_v39, %v1462_v15  ;;  %v2042_v62 = vpop.f32.mrb[26].mxu0  ;;  %2440 = vmatprep.mubr.bf16.mxu1 %v2212_v38 }
 0x228   :  { %v3378_v32 = vadd.f32 %v2042_v62, %v1464_v63  ;;  %v2044_v35 = vpop.f32.mrb[27].mxu0  ;;  %2441 = vmatmul.mubr.bf16.gmra.mrb[84].mxu1 %v2211_v51  ;;  %v2161_v33 = vmax.f32 %v3374_v55, 0.0  ;;  %v1490_v63 = vadd.f32 %v4893_v16, %v4953_v46  ;;  %v1492_v55 = vadd.f32 %v4895_v17, %v4955_v52 }
 0x229   :  { %v3380_v0 = vadd.f32 %v2044_v35, %v1466_v45  ;;  %v2162_v1 = vmax.f32 %v3376_v13, 0.0  ;;  %v1494_v45 = vadd.f32 %v4898_v18, %v4953_v46 }
 0x22a   :  { %v2163_v58 = vmax.f32 %v3378_v32, 0.0  ;;  %v1496_v32 = vadd.f32 %v4900_v19, %v4955_v52 }
 0x22b   :  { %v2164_v28 = vmax.f32 %v3380_v0, 0.0 }
 0x22c   :  { %v2213_v56 = vpack.c.bf16 %v2163_v58, %v2161_v33 }
 0x22d   :  { %v2214_v59 = vpack.c.bf16 %v2164_v28, %v2162_v1  ;;  %v2048_v2 = vpop.f32.mrb[28].mxu0 }
 0x22e   :  { %v3382_v34 = vadd.f32 %v2048_v2, %v1470_v41  ;;  %v2050_v26 = vpop.f32.mrb[29].mxu0  ;;  %v1504_v2 = vadd.f32 %v4906_v11, %v4953_v46 }
 0x22f   :  { %v3384_v27 = vadd.f32 %v2050_v26, %v1472_v3  ;;  %v2052_v47 = vpop.f32.mrb[30].mxu0  ;;  %2448 = vmatprep.mubr.bf16.mxu1 %v2214_v59  ;;  %v1502_v3 = vadd.f32 %v4904_v21, %v4955_v52  ;;  %v1506_v26 = vadd.f32 %v4908_v22, %v4955_v52 }
 0x230   :  { %v3386_v44 = vadd.f32 %v2052_v47, %v1474_v42  ;;  %v2054_v48 = vpop.f32.mrb[31].mxu0  ;;  %2449 = vmatmul.mubr.bf16.gmra.mrb[88].mxu1 %v2213_v56  ;;  %v2165_v60 = vmax.f32 %v3382_v34, 0.0  ;;  %v1500_v56 = vadd.f32 %v4902_v20, %v4953_v46 }
 0x231   :  { %v3388_v4 = vadd.f32 %v2054_v48, %v1476_v43  ;;  %v2166_v5 = vmax.f32 %v3384_v27, 0.0 }
 0x232   :  { %v2167_v61 = vmax.f32 %v3386_v44, 0.0 }
 0x233   :  { %v2168_v30 = vmax.f32 %v3388_v4, 0.0 }
 0x234   :  { %v2215_v6 = vpack.c.bf16 %v2167_v61, %v2165_v60  ;;  %v1510_v61 = vadd.f32 %v4910_v23, %v4953_v46 }
 0x235   :  { %v2216_v36 = vpack.c.bf16 %v2168_v30, %v2166_v5  ;;  %v2058_v7 = vpop.f32.mrb[32].mxu0  ;;  %v1512_v5 = vadd.f32 %v4912_v24, %v4955_v52 }
 0x236   :  { %v3390_v49 = vadd.f32 %v2058_v7, %v1480_v31  ;;  %v2060_v29 = vpop.f32.mrb[33].mxu0  ;;  %v1514_v31 = vadd.f32 %v4914_v25, %v4953_v46 }
 0x237   :  { %v3392_v50 = vadd.f32 %v2060_v29, %v1482_v57  ;;  %v2062_v54 = vpop.f32.mrb[34].mxu0  ;;  %2456 = vmatprep.mubr.bf16.mxu1 %v2216_v36  ;;  %v5220_v36 = vld [vmem:[#allocation5_spill] sm:$0xff] }
 0x238   :  { %v3394_v40 = vadd.f32 %v2062_v54, %v1484_v8  ;;  %v2064_v51 = vpop.f32.mrb[35].mxu0  ;;  %2457 = vmatmul.mubr.bf16.gmra.mrb[92].mxu1 %v2215_v6  ;;  %v2169_v15 = vmax.f32 %v3390_v49, 0.0  ;;  %v1516_v7 = vadd.f32 %v5220_v36, %v4955_v52  ;;  %v5230_v36 = vld [vmem:[#allocation15_spill] sm:$0xff] }
 0x239   :  { %v3396_v9 = vadd.f32 %v2064_v51, %v1486_v37  ;;  %v2170_v10 = vmax.f32 %v3392_v50, 0.0  ;;  %v5221_v51 = vld [vmem:[#allocation6_spill] sm:$0xff] }
 0x23a   :  { %v2171_v38 = vmax.f32 %v3394_v40, 0.0 }
 0x23b   :  { %v2172_v53 = vmax.f32 %v3396_v9, 0.0  ;;  %v3421_v9 = vadd.f32 %v5221_v51, %v4953_v46 }
 0x23c   :  { %v2217_v12 = vpack.c.bf16 %v2171_v38, %v2169_v15  ;;  %v5222_v15 = vld [vmem:[#allocation7_spill] sm:$0xff] }
 0x23d   :  { %v2218_v39 = vpack.c.bf16 %v2172_v53, %v2170_v10  ;;  %v2068_v14 = vpop.f32.mrb[36].mxu0  ;;  %v3423_v38 = vadd.f32 %v5222_v15, %v4955_v52 }
 0x23e   :  { %v3398_v13 = vadd.f32 %v2068_v14, %v1490_v63  ;;  %v2070_v62 = vpop.f32.mrb[37].mxu0  ;;  %v3912_v63 = vld [vmem:[%s5200_s5 + $0x20] sm:$0xff]  }
 0x23f   :  { %v3400_v35 = vadd.f32 %v2070_v62, %v1492_v55  ;;  %v2072_v0 = vpop.f32.mrb[38].mxu0  ;;  %2464 = vmatprep.mubr.bf16.mxu1 %v2218_v39  ;;  %3253 = vmatprep.subr.bf16.mxu1 %v3912_v63 }
 0x240   :  { %v3402_v33 = vadd.f32 %v2072_v0, %v1494_v45  ;;  %v2074_v58 = vpop.f32.mrb[39].mxu0  ;;  %2465 = vmatmul.mubr.bf16.gmra.mrb[96].mxu1 %v2217_v12  ;;  %v2173_v1 = vmax.f32 %v3398_v13, 0.0  ;;  %v5223_v12 = vld [vmem:[#allocation8_spill] sm:$0xff]  ;;  %v5224_v45 = vld [vmem:[#allocation9_spill] sm:$0xff] }
 0x241   :  { %v3404_v16 = vadd.f32 %v2074_v58, %v1496_v32  ;;  %v2174_v17 = vmax.f32 %v3400_v35, 0.0  ;;  %v3425_v55 = vadd.f32 %v5223_v12, %v4953_v46  ;;  %v3427_v13 = vadd.f32 %v5224_v45, %v4955_v52  ;;  %3254 = vmatpush3.bf16.msra.mxu1 %v3912_v63  ;;  %v3913_v58 = vld [vmem:[%s5200_s5 + $0x28] sm:$0xff]  }
 0x242   :  { %v2175_v28 = vmax.f32 %v3402_v33, 0.0  ;;  %3255 = vmatprep.subr.bf16.mxu1 %v3913_v58  ;;  %v5233_v12 = vld [vmem:[#allocation18_spill] sm:$0xff] }
 0x243   :  { %v2176_v41 = vmax.f32 %v3404_v16, 0.0 }
 0x244   :  { %v2219_v18 = vpack.c.bf16 %v2175_v28, %v2173_v1 }
 0x245   :  { %v2220_v59 = vpack.c.bf16 %v2176_v41, %v2174_v17  ;;  %v2078_v19 = vpop.f32.mrb[40].mxu0  ;;  %v5225_v41 = vld [vmem:[#allocation10_spill] sm:$0xff]  ;;  %3256 = vmatpush3.bf16.msra.mxu1 %v3913_v58  ;;  %v5236_v58 = vld [vmem:[#allocation21_spill] sm:$0xff] }
 0x246   :  { %v3406_v42 = vadd.f32 %v2078_v19, %v1500_v56  ;;  %v2080_v34 = vpop.f32.mrb[41].mxu0  ;;  %v3429_v56 = vadd.f32 %v5225_v41, %v4953_v46 }
 0x247   :  { %v3408_v43 = vadd.f32 %v2080_v34, %v1502_v3  ;;  %v2082_v27 = vpop.f32.mrb[42].mxu0  ;;  %2472 = vmatprep.mubr.bf16.mxu1 %v2220_v59  ;;  %v5226_v3 = vld [vmem:[#allocation11_spill] sm:$0xff]  ;;  %v5227_v34 = vld [vmem:[#allocation12_spill] sm:$0xff] }
 0x248   :  { %v3410_v47 = vadd.f32 %v2082_v27, %v1504_v2  ;;  %v2084_v44 = vpop.f32.mrb[43].mxu0  ;;  %2473 = vmatmul.mubr.bf16.gmra.mrb[100].mxu1 %v2219_v18  ;;  %v2177_v48 = vmax.f32 %v3406_v42, 0.0  ;;  %v3431_v59 = vadd.f32 %v5226_v3, %v4955_v52  ;;  %v3914_v42 = vld [vmem:[%s5200_s5 + $0x30] sm:$0xff]  }
 0x249   :  { %v3412_v20 = vadd.f32 %v2084_v44, %v1506_v26  ;;  %v2178_v21 = vmax.f32 %v3408_v43, 0.0  ;;  %v3433_v26 = vadd.f32 %v5227_v34, %v4953_v46  ;;  %3257 = vmatprep.subr.bf16.mxu1 %v3914_v42 }
 0x24a   :  { %v2179_v4 = vmax.f32 %v3410_v47, 0.0  ;;  %v5228_v47 = vld [vmem:[#allocation13_spill] sm:$0xff]  ;;  %3258 = vmatpush3.bf16.msra.mxu1 %v3914_v42 }
 0x24b   :  { %v2180_v60 = vmax.f32 %v3412_v20, 0.0  ;;  %v3435_v44 = vadd.f32 %v5228_v47, %v4955_v52 }
 0x24c   :  { %v2221_v11 = vpack.c.bf16 %v2179_v4, %v2177_v48 }
 0x24d   :  { %v2222_v30 = vpack.c.bf16 %v2180_v60, %v2178_v21  ;;  %v2088_v22 = vpop.f32.mrb[44].mxu0 }
 0x24e   :  { %v3414_v6 = vadd.f32 %v2088_v22, %v1510_v61  ;;  %v2090_v57 = vpop.f32.mrb[45].mxu0  ;;  %v3915_v61 = vld [vmem:[%s5200_s5 + $0x38] sm:$0xff]  }
 0x24f   :  { %v3416_v8 = vadd.f32 %v2090_v57, %v1512_v5  ;;  %v2092_v49 = vpop.f32.mrb[46].mxu0  ;;  %2480 = vmatprep.mubr.bf16.mxu1 %v2222_v30  ;;  %3259 = vmatprep.subr.bf16.mxu1 %v3915_v61 }
 0x250   :  { %v3418_v29 = vadd.f32 %v2092_v49, %v1514_v31  ;;  %v2094_v37 = vpop.f32.mrb[47].mxu0  ;;  %2481 = vmatmul.mubr.bf16.gmra.mrb[104].mxu1 %v2221_v11  ;;  %v2181_v50 = vmax.f32 %v3414_v6, 0.0  ;;  %v5229_v31 = vld [vmem:[#allocation14_spill] sm:$0xff] }
 0x251   :  { %v3420_v23 = vadd.f32 %v2094_v37, %v1516_v7  ;;  %v2182_v24 = vmax.f32 %v3416_v8, 0.0  ;;  %v3437_v6 = vadd.f32 %v5229_v31, %v4953_v46  ;;  %v3439_v7 = vadd.f32 %v5230_v36, %v4955_v52  ;;  %3260 = vmatpush3.bf16.msra.mxu1 %v3915_v61 }
 0x252   :  { %v2183_v54 = vmax.f32 %v3418_v29, 0.0  ;;  %v5231_v29 = vld [vmem:[#allocation16_spill] sm:$0xff] }
 0x253   :  { %v2184_v40 = vmax.f32 %v3420_v23, 0.0  ;;  %v3441_v37 = vadd.f32 %v5231_v29, %v4953_v46 }
 0x254   :  { %v2223_v25 = vpack.c.bf16 %v2183_v54, %v2181_v50  ;;  %v5232_v54 = vld [vmem:[#allocation17_spill] sm:$0xff] }
 0x255   :  { %v2224_v10 = vpack.c.bf16 %v2184_v40, %v2182_v24  ;;  %v2098_v53 = vpop.f32.mrb[48].mxu0  ;;  %v3443_v24 = vadd.f32 %v5232_v54, %v4955_v52 }
 0x256   :  { %v3422_v39 = vadd.f32 %v3421_v9, %v2098_v53  ;;  %v2100_v14 = vpop.f32.mrb[49].mxu0 }
 0x257   :  { %v3424_v62 = vadd.f32 %v3423_v38, %v2100_v14  ;;  %v2102_v32 = vpop.f32.mrb[50].mxu0  ;;  %2488 = vmatprep.mubr.bf16.mxu1 %v2224_v10  ;;  %v5234_v14 = vld [vmem:[#allocation19_spill] sm:$0xff] }
 0x258   :  { %v3426_v35 = vadd.f32 %v3425_v55, %v2102_v32  ;;  %v2104_v0 = vpop.f32.mrb[51].mxu0  ;;  %2489 = vmatmul.mubr.bf16.gmra.mrb[108].mxu1 %v2223_v25  ;;  %v2185_v16 = vmax.f32 %v3422_v39, 0.0  ;;  %v3445_v55 = vadd.f32 %v5233_v12, %v4953_v46  ;;  %v3447_v45 = vadd.f32 %v5234_v14, %v4955_v52  ;;  %v5235_v32 = vld [vmem:[#allocation20_spill] sm:$0xff] }
 0x259   :  { %v3428_v33 = vadd.f32 %v3427_v13, %v2104_v0  ;;  %v2186_v28 = vmax.f32 %v3424_v62, 0.0 }
 0x25a   :  { %v2187_v1 = vmax.f32 %v3426_v35, 0.0  ;;  %v3449_v35 = vadd.f32 %v5235_v32, %v4953_v46 }
 0x25b   :  { %v2188_v17 = vmax.f32 %v3428_v33, 0.0 }
 0x25c   :  { %v2225_v18 = vpack.c.bf16 %v2187_v1, %v2185_v16  ;;  %v3451_v16 = vadd.f32 %v5236_v58, %v4955_v52  ;;  %v5112_v52 = vld [vmem:[%s5199_s4] ss:$0 sm:$0xff] }
 0x25d   :  { %v2226_v19 = vpack.c.bf16 %v2188_v17, %v2186_v28  ;;  %v2108_v2 = vpop.f32.mrb[52].mxu0 }
 0x25e   :  { %v3430_v43 = vadd.f32 %v3429_v56, %v2108_v2  ;;  %v2110_v27 = vpop.f32.mrb[53].mxu0 }
 0x25f   :  { %v3432_v20 = vadd.f32 %v3431_v59, %v2110_v27  ;;  %v2112_v48 = vpop.f32.mrb[54].mxu0  ;;  %2496 = vmatprep.mubr.bf16.mxu1 %v2226_v19 }
 0x260   :  { %v3434_v4 = vadd.f32 %v3433_v26, %v2112_v48  ;;  %v2114_v21 = vpop.f32.mrb[55].mxu0  ;;  %2497 = vmatmul.mubr.bf16.gmra.mrb[112].mxu1 %v2225_v18  ;;  %v2189_v11 = vmax.f32 %v3430_v43, 0.0 }
 0x261   :  { %v3436_v60 = vadd.f32 %v3435_v44, %v2114_v21  ;;  %v2190_v30 = vmax.f32 %v3432_v20, 0.0 }
 0x262   :  { %v2191_v5 = vmax.f32 %v3434_v4, 0.0 }
 0x263   :  { %v2192_v22 = vmax.f32 %v3436_v60, 0.0 }
 0x264   :  { %v2227_v57 = vpack.c.bf16 %v2191_v5, %v2189_v11 }
 0x265   :  { %v2228_v8 = vpack.c.bf16 %v2192_v22, %v2190_v30  ;;  %v2118_v49 = vpop.f32.mrb[56].mxu0 }
 0x266   :  { %v3438_v23 = vadd.f32 %v3437_v6, %v2118_v49  ;;  %v2120_v50 = vpop.f32.mrb[57].mxu0 }
 0x267   :  { %v3440_v40 = vadd.f32 %v3439_v7, %v2120_v50  ;;  %v2122_v51 = vpop.f32.mrb[58].mxu0  ;;  %2504 = vmatprep.mubr.bf16.mxu1 %v2228_v8 }
 0x268   :  { %v3442_v9 = vadd.f32 %v3441_v37, %v2122_v51  ;;  %v2124_v25 = vpop.f32.mrb[59].mxu0  ;;  %2505 = vmatmul.mubr.bf16.gmra.mrb[116].mxu1 %v2227_v57  ;;  %v2193_v38 = vmax.f32 %v3438_v23, 0.0 }
 0x269   :  { %v3444_v15 = vadd.f32 %v3443_v24, %v2124_v25  ;;  %v2194_v53 = vmax.f32 %v3440_v40, 0.0 }
 0x26a   :  { %v2195_v10 = vmax.f32 %v3442_v9, 0.0 }
 0x26b   :  { %v2196_v63 = vmax.f32 %v3444_v15, 0.0 }
 0x26c   :  { %v2229_v39 = vpack.c.bf16 %v2195_v10, %v2193_v38 }
 0x26d   :  { %v2230_v13 = vpack.c.bf16 %v2196_v63, %v2194_v53  ;;  %v2128_v62 = vpop.f32.mrb[60].mxu0 }
 0x26e   :  { %v3446_v0 = vadd.f32 %v3445_v55, %v2128_v62  ;;  %v2130_v33 = vpop.f32.mrb[61].mxu0 }
 0x26f   :  { %v3448_v1 = vadd.f32 %v3447_v45, %v2130_v33  ;;  %v2132_v28 = vpop.f32.mrb[62].mxu0  ;;  %2512 = vmatprep.mubr.bf16.mxu1 %v2230_v13 }
 0x270   :  { %v3450_v17 = vadd.f32 %v3449_v35, %v2132_v28  ;;  %v2134_v41 = vpop.f32.mrb[63].mxu0  ;;  %2513 = vmatmul.mubr.bf16.gmra.mrb[120].mxu1 %v2229_v39  ;;  %v2197_v18 = vmax.f32 %v3446_v0, 0.0 }
 0x271   :  { %v3452_v56 = vadd.f32 %v3451_v16, %v2134_v41  ;;  %v2198_v59 = vmax.f32 %v3448_v1, 0.0 }
 0x272   :  { %v2199_v3 = vmax.f32 %v3450_v17, 0.0 }
 0x273   :  { %v2200_v19 = vmax.f32 %v3452_v56, 0.0 }
 0x274   :  { %v2231_v2 = vpack.c.bf16 %v2199_v3, %v2197_v18 }
 0x275   :  { %v2232_v42 = vpack.c.bf16 %v2200_v19, %v2198_v59 }
 0x277   :  { %2520 = vmatprep.mubr.bf16.mxu1 %v2232_v42 }
 0x278   :  { %2521 = vmatmul.mubr.bf16.gmra.mrb[124].mxu1 %v2231_v2 }
 0x2d3   :  { %v3125_v46 = vpop.f32.mrb[64].mxu1 }
 0x2d4   :  { %v3126_v34 = vpop.f32.mrb[65].mxu1 }
 0x2d5   :  { %v3127_v26 = vadd.f32 %v3126_v34, %v3125_v46  ;;  %v3128_v43 = vpop.f32.mrb[66].mxu1 }
 0x2d6   :  { %v3129_v27 = vpop.f32.mrb[67].mxu1 }
 0x2d7   :  { %v2403_v47 = vadd.f32 %v3127_v26, %v5112_v52  ;;  %v3130_v44 = vadd.f32 %v3129_v27, %v3128_v43 }
 0x2d9   :  { %v2406_v20 = vadd.f32 %v3130_v44, %v5112_v52  ;;  %v2529_v48 = vmax.f32 %v2403_v47, 0.0 }
 0x2db   :  { %v2530_v4 = vmax.f32 %v2406_v20, 0.0  ;;  %v3131_v21 = vpop.f32.mrb[68].mxu1 }
 0x2dc   :  { %v3132_v60 = vpop.f32.mrb[69].mxu1 }
 0x2dd   :  { %v3133_v61 = vadd.f32 %v3132_v60, %v3131_v21  ;;  %v3134_v11 = vpop.f32.mrb[70].mxu1  ;;  %v2561_v5 = vpack.c.bf16 %v2530_v4, %v2529_v48 }
 0x2de   :  { %v3135_v30 = vpop.f32.mrb[71].mxu1 }
 0x2df   :  { %v2411_v22 = vadd.f32 %v3133_v61, %v5112_v52  ;;  %v3136_v31 = vadd.f32 %v3135_v30, %v3134_v11  ;;  %3261 = vmatprep.mubr.bf16.mxu1 %v2561_v5 }
 0x2e1   :  { %v2414_v6 = vadd.f32 %v3136_v31, %v5112_v52  ;;  %v2531_v57 = vmax.f32 %v2411_v22, 0.0 }
 0x2e3   :  { %v2532_v36 = vmax.f32 %v2414_v6, 0.0  ;;  %v3137_v7 = vpop.f32.mrb[72].mxu1 }
 0x2e4   :  { %v3138_v8 = vpop.f32.mrb[73].mxu1 }
 0x2e5   :  { %v2562_v49 = vpack.c.bf16 %v2532_v36, %v2531_v57  ;;  %v3139_v29 = vadd.f32 %v3138_v8, %v3137_v7  ;;  %v3140_v37 = vpop.f32.mrb[74].mxu1 }
 0x2e6   :  { %v3141_v23 = vpop.f32.mrb[75].mxu1 }
 0x2e7   :  { %v2419_v50 = vadd.f32 %v3139_v29, %v5112_v52  ;;  %v3142_v54 = vadd.f32 %v3141_v23, %v3140_v37  ;;  %3262 = vmatmul.mubr.bf16.vlgmr.msra.gmra.mrb[128].mxu1 %v2562_v49 }
 0x2e9   :  { %v2422_v24 = vadd.f32 %v3142_v54, %v5112_v52  ;;  %v2533_v40 = vmax.f32 %v2419_v50, 0.0 }
 0x2eb   :  { %v2534_v51 = vmax.f32 %v2422_v24, 0.0  ;;  %v3143_v9 = vpop.f32.mrb[76].mxu1 }
 0x2ec   :  { %v3144_v25 = vpop.f32.mrb[77].mxu1 }
 0x2ed   :  { %v3145_v15 = vadd.f32 %v3144_v25, %v3143_v9  ;;  %v3146_v38 = vpop.f32.mrb[78].mxu1  ;;  %v2563_v10 = vpack.c.bf16 %v2534_v51, %v2533_v40 }
 0x2ee   :  { %v3147_v53 = vpop.f32.mrb[79].mxu1 }
 0x2ef   :  { %v2427_v63 = vadd.f32 %v3145_v15, %v5112_v52  ;;  %v3148_v12 = vadd.f32 %v3147_v53, %v3146_v38  ;;  %3265 = vmatprep.mubr.bf16.mxu1 %v2563_v10 }
 0x2f1   :  { %v2430_v55 = vadd.f32 %v3148_v12, %v5112_v52  ;;  %v2535_v39 = vmax.f32 %v2427_v63, 0.0 }
 0x2f3   :  { %v2536_v14 = vmax.f32 %v2430_v55, 0.0  ;;  %v3149_v45 = vpop.f32.mrb[80].mxu1 }
 0x2f4   :  { %v3150_v13 = vpop.f32.mrb[81].mxu1 }
 0x2f5   :  { %v3151_v62 = vadd.f32 %v3150_v13, %v3149_v45  ;;  %v3152_v32 = vpop.f32.mrb[82].mxu1  ;;  %v2564_v35 = vpack.c.bf16 %v2536_v14, %v2535_v39 }
 0x2f6   :  { %v3153_v0 = vpop.f32.mrb[83].mxu1 }
 0x2f7   :  { %v2435_v33 = vadd.f32 %v3151_v62, %v5112_v52  ;;  %v3154_v58 = vadd.f32 %v3153_v0, %v3152_v32  ;;  %3266 = vmatmul.mubr.bf16.gmra.mrb[132].mxu1 %v2564_v35 }
 0x2f9   :  { %v2438_v16 = vadd.f32 %v3154_v58, %v5112_v52  ;;  %v2537_v1 = vmax.f32 %v2435_v33, 0.0 }
 0x2fb   :  { %v2538_v28 = vmax.f32 %v2438_v16, 0.0  ;;  %v3155_v17 = vpop.f32.mrb[84].mxu1 }
 0x2fc   :  { %v3156_v41 = vpop.f32.mrb[85].mxu1 }
 0x2fd   :  { %v3157_v56 = vadd.f32 %v3156_v41, %v3155_v17  ;;  %v3158_v18 = vpop.f32.mrb[86].mxu1  ;;  %v2565_v3 = vpack.c.bf16 %v2538_v28, %v2537_v1 }
 0x2fe   :  { %v3159_v59 = vpop.f32.mrb[87].mxu1 }
 0x2ff   :  { %v2443_v19 = vadd.f32 %v3157_v56, %v5112_v52  ;;  %v3160_v2 = vadd.f32 %v3159_v59, %v3158_v18  ;;  %3269 = vmatprep.mubr.bf16.mxu1 %v2565_v3 }
 0x301   :  { %v2446_v42 = vadd.f32 %v3160_v2, %v5112_v52  ;;  %v2539_v46 = vmax.f32 %v2443_v19, 0.0 }
 0x303   :  { %v2540_v34 = vmax.f32 %v2446_v42, 0.0  ;;  %v3161_v26 = vpop.f32.mrb[88].mxu1 }
 0x304   :  { %v3162_v43 = vpop.f32.mrb[89].mxu1 }
 0x305   :  { %v3163_v27 = vadd.f32 %v3162_v43, %v3161_v26  ;;  %v3164_v47 = vpop.f32.mrb[90].mxu1  ;;  %v2566_v44 = vpack.c.bf16 %v2540_v34, %v2539_v46 }
 0x306   :  { %v3165_v20 = vpop.f32.mrb[91].mxu1 }
 0x307   :  { %v2451_v48 = vadd.f32 %v3163_v27, %v5112_v52  ;;  %v3166_v4 = vadd.f32 %v3165_v20, %v3164_v47  ;;  %3270 = vmatmul.mubr.bf16.gmra.mrb[136].mxu1 %v2566_v44 }
 0x309   :  { %v2454_v21 = vadd.f32 %v3166_v4, %v5112_v52  ;;  %v2541_v60 = vmax.f32 %v2451_v48, 0.0 }
 0x30b   :  { %v2542_v61 = vmax.f32 %v2454_v21, 0.0  ;;  %v3167_v11 = vpop.f32.mrb[92].mxu1 }
 0x30c   :  { %v3168_v5 = vpop.f32.mrb[93].mxu1 }
 0x30d   :  { %v3169_v30 = vadd.f32 %v3168_v5, %v3167_v11  ;;  %v3170_v22 = vpop.f32.mrb[94].mxu1  ;;  %v2567_v31 = vpack.c.bf16 %v2542_v61, %v2541_v60 }
 0x30e   :  { %v3171_v6 = vpop.f32.mrb[95].mxu1 }
 0x30f   :  { %v2459_v57 = vadd.f32 %v3169_v30, %v5112_v52  ;;  %v3172_v36 = vadd.f32 %v3171_v6, %v3170_v22  ;;  %3273 = vmatprep.mubr.bf16.mxu1 %v2567_v31 }
 0x311   :  { %v2462_v7 = vadd.f32 %v3172_v36, %v5112_v52  ;;  %v2543_v8 = vmax.f32 %v2459_v57, 0.0 }
 0x313   :  { %v2544_v49 = vmax.f32 %v2462_v7, 0.0  ;;  %v3173_v29 = vpop.f32.mrb[96].mxu1 }
 0x314   :  { %v3174_v37 = vpop.f32.mrb[97].mxu1 }
 0x315   :  { %v3175_v23 = vadd.f32 %v3174_v37, %v3173_v29  ;;  %v3176_v50 = vpop.f32.mrb[98].mxu1  ;;  %v2568_v54 = vpack.c.bf16 %v2544_v49, %v2543_v8 }
 0x316   :  { %v3177_v24 = vpop.f32.mrb[99].mxu1 }
 0x317   :  { %v2467_v40 = vadd.f32 %v3175_v23, %v5112_v52  ;;  %v3178_v51 = vadd.f32 %v3177_v24, %v3176_v50  ;;  %3274 = vmatmul.mubr.bf16.gmra.mrb[140].mxu1 %v2568_v54 }
 0x319   :  { %v2470_v9 = vadd.f32 %v3178_v51, %v5112_v52  ;;  %v2545_v25 = vmax.f32 %v2467_v40, 0.0 }
 0x31b   :  { %v2546_v15 = vmax.f32 %v2470_v9, 0.0  ;;  %v3179_v38 = vpop.f32.mrb[100].mxu1 }
 0x31c   :  { %v3180_v10 = vpop.f32.mrb[101].mxu1 }
 0x31d   :  { %v3181_v53 = vadd.f32 %v3180_v10, %v3179_v38  ;;  %v3182_v63 = vpop.f32.mrb[102].mxu1  ;;  %v2569_v12 = vpack.c.bf16 %v2546_v15, %v2545_v25 }
 0x31e   :  { %v3183_v55 = vpop.f32.mrb[103].mxu1 }
 0x31f   :  { %v2475_v39 = vadd.f32 %v3181_v53, %v5112_v52  ;;  %v3184_v14 = vadd.f32 %v3183_v55, %v3182_v63  ;;  %3277 = vmatprep.mubr.bf16.mxu1 %v2569_v12 }
 0x321   :  { %v2478_v45 = vadd.f32 %v3184_v14, %v5112_v52  ;;  %v2547_v13 = vmax.f32 %v2475_v39, 0.0 }
 0x323   :  { %v2548_v62 = vmax.f32 %v2478_v45, 0.0  ;;  %v3185_v32 = vpop.f32.mrb[104].mxu1 }
 0x324   :  { %v3186_v35 = vpop.f32.mrb[105].mxu1 }
 0x325   :  { %v3187_v0 = vadd.f32 %v3186_v35, %v3185_v32  ;;  %v3188_v33 = vpop.f32.mrb[106].mxu1  ;;  %v2570_v58 = vpack.c.bf16 %v2548_v62, %v2547_v13 }
 0x326   :  { %v3189_v16 = vpop.f32.mrb[107].mxu1 }
 0x327   :  { %v2483_v1 = vadd.f32 %v3187_v0, %v5112_v52  ;;  %v3190_v28 = vadd.f32 %v3189_v16, %v3188_v33  ;;  %3278 = vmatmul.mubr.bf16.gmra.mrb[144].mxu1 %v2570_v58  ;;  %v5149_v58 = vld [vmem:[%s5201_s6] ss:$0 sm:$0xff]  ;;  %s3941_s6 = smov [#allocation2]  }
 0x328   :  { %s2846_s24 = sshll.u32 %s3941_s6, 4  ;;  %s2847_s24 = int_to_ptr.vmem [resolvable:$true] %s2846_s24 }
 0x329   :  { %v2486_v17 = vadd.f32 %v3190_v28, %v5112_v52  ;;  %v2549_v41 = vmax.f32 %v2483_v1, 0.0  ;;  %s3916_s25 = scalar_lea.vmem %s2847_s24, 4096  ;;  %p3921_p1 = scmp.lt.s32.totalorder %s2847_s24, %s2847_s24 }
 0x32a   :  { %p3917_p0 = scmp.ne.s32.totalorder %s2847_s24, %s3916_s25  ;;  %p3922_p2 = scmp.lt.s32.totalorder %s3916_s25, %s3916_s25 }
 0x32b   :  { %v2550_v56 = vmax.f32 %v2486_v17, 0.0  ;;  %v3191_v18 = vpop.f32.mrb[108].mxu1 }
 0x32c   :  { %v3192_v3 = vpop.f32.mrb[109].mxu1  ;;  %p3923_p3 = por %p3922_p2, %p3921_p1 }
 0x32d   :  { %v3193_v59 = vadd.f32 %v3192_v3, %v3191_v18  ;;  %v3194_v19 = vpop.f32.mrb[110].mxu1  ;;  %v2571_v2 = vpack.c.bf16 %v2550_v56, %v2549_v41 }
 0x32e   :  { %v3195_v42 = vpop.f32.mrb[111].mxu1  ;;  %p3924_p4 = pnand %p3923_p3, %p3917_p0 }
 0x32f   :  { %v2491_v46 = vadd.f32 %v3193_v59, %v5112_v52  ;;  %v3196_v34 = vadd.f32 %v3195_v42, %v3194_v19  ;;  %3281 = vmatprep.mubr.bf16.mxu1 %v2571_v2 }
 0x331   :  { %v2494_v26 = vadd.f32 %v3196_v34, %v5112_v52  ;;  %v2551_v43 = vmax.f32 %v2491_v46, 0.0 }
 0x333   :  { %v2552_v27 = vmax.f32 %v2494_v26, 0.0  ;;  %v3197_v47 = vpop.f32.mrb[112].mxu1 }
 0x334   :  { %v3198_v44 = vpop.f32.mrb[113].mxu1 }
 0x335   :  { %v3199_v20 = vadd.f32 %v3198_v44, %v3197_v47  ;;  %v3200_v48 = vpop.f32.mrb[114].mxu1  ;;  %v2572_v4 = vpack.c.bf16 %v2552_v27, %v2551_v43 }
 0x336   :  { %v3201_v21 = vpop.f32.mrb[115].mxu1 }
 0x337   :  { %v2499_v60 = vadd.f32 %v3199_v20, %v5112_v52  ;;  %v3202_v61 = vadd.f32 %v3201_v21, %v3200_v48  ;;  %3282 = vmatmul.mubr.bf16.gmra.mrb[148].mxu1 %v2572_v4 }
 0x339   :  { %v2502_v11 = vadd.f32 %v3202_v61, %v5112_v52  ;;  %v2553_v5 = vmax.f32 %v2499_v60, 0.0 }
 0x33b   :  { %v2554_v30 = vmax.f32 %v2502_v11, 0.0  ;;  %v3203_v22 = vpop.f32.mrb[116].mxu1 }
 0x33c   :  { %v3204_v31 = vpop.f32.mrb[117].mxu1 }
 0x33d   :  { %v3205_v6 = vadd.f32 %v3204_v31, %v3203_v22  ;;  %v3206_v57 = vpop.f32.mrb[118].mxu1  ;;  %v2573_v36 = vpack.c.bf16 %v2554_v30, %v2553_v5 }
 0x33e   :  { %v3207_v7 = vpop.f32.mrb[119].mxu1 }
 0x33f   :  { %v2507_v8 = vadd.f32 %v3205_v6, %v5112_v52  ;;  %v3208_v49 = vadd.f32 %v3207_v7, %v3206_v57  ;;  %3285 = vmatprep.mubr.bf16.mxu1 %v2573_v36 }
 0x341   :  { %v2510_v29 = vadd.f32 %v3208_v49, %v5112_v52  ;;  %v2555_v37 = vmax.f32 %v2507_v8, 0.0 }
 0x343   :  { %v2556_v23 = vmax.f32 %v2510_v29, 0.0  ;;  %v3209_v50 = vpop.f32.mrb[120].mxu1 }
 0x344   :  { %v3210_v54 = vpop.f32.mrb[121].mxu1 }
 0x345   :  { %v3211_v24 = vadd.f32 %v3210_v54, %v3209_v50  ;;  %v3212_v40 = vpop.f32.mrb[122].mxu1  ;;  %v2574_v51 = vpack.c.bf16 %v2556_v23, %v2555_v37 }
 0x346   :  { %v3213_v9 = vpop.f32.mrb[123].mxu1 }
 0x347   :  { %v2515_v25 = vadd.f32 %v3211_v24, %v5112_v52  ;;  %v3214_v15 = vadd.f32 %v3213_v9, %v3212_v40  ;;  %3286 = vmatmul.mubr.bf16.gmra.mrb[152].mxu1 %v2574_v51 }
 0x349   :  { %v2518_v38 = vadd.f32 %v3214_v15, %v5112_v52  ;;  %v2557_v10 = vmax.f32 %v2515_v25, 0.0 }
 0x34b   :  { %v2558_v53 = vmax.f32 %v2518_v38, 0.0  ;;  %v3215_v63 = vpop.f32.mrb[124].mxu1 }
 0x34c   :  { %v3216_v12 = vpop.f32.mrb[125].mxu1 }
 0x34d   :  { %v3217_v55 = vadd.f32 %v3216_v12, %v3215_v63  ;;  %v3218_v39 = vpop.f32.mrb[126].mxu1  ;;  %v2575_v14 = vpack.c.bf16 %v2558_v53, %v2557_v10 }
 0x34e   :  { %v3219_v45 = vpop.f32.mrb[127].mxu1 }
 0x34f   :  { %v2523_v13 = vadd.f32 %v3217_v55, %v5112_v52  ;;  %v3220_v62 = vadd.f32 %v3219_v45, %v3218_v39  ;;  %3289 = vmatprep.mubr.bf16.mxu1 %v2575_v14 }
 0x351   :  { %v2526_v32 = vadd.f32 %v3220_v62, %v5112_v52  ;;  %v2559_v35 = vmax.f32 %v2523_v13, 0.0 }
 0x353   :  { %v2560_v0 = vmax.f32 %v2526_v32, 0.0 }
 0x355   :  { %v2576_v33 = vpack.c.bf16 %v2560_v0, %v2559_v35 }
 0x357   :  { %3290 = vmatmul.mubr.bf16.gmra.mrb[156].mxu1 %v2576_v33 }
 0x3ba   :  { %v3263_v16 = vpop.f32.mrb[128].mxu1 }
 0x3bb   :  { %v2691_v1 = vadd.f32 %v3263_v16, %v5149_v58  ;;  %v2682_v28 = vpop.f32.mrb[129].mxu1 }
 0x3bc   :  { %v2683_v17 = vadd.f32 %v5149_v58, %v2682_v28  ;;  %v3264_v41 = vpop.f32.mrb[130].mxu1 }
 0x3bd   :  { %2811 = vst [vmem:[#allocation2 + $0x10] sm:$0xff] %v2691_v1  ;;  %v2694_v56 = vadd.f32 %v3264_v41, %v5149_v58  ;;  %v2685_v52 = vpop.f32.mrb[131].mxu1 }
 0x3be   :  { %2809 = vst [vmem:[#allocation2] sm:$0xff] %v2683_v17  ;;  %v2686_v18 = vadd.f32 %v5149_v58, %v2685_v52 }
 0x3bf   :  { %2812 = vst [vmem:[#allocation2 + $0x18] sm:$0xff] %v2694_v56 }
 0x3c0   :  { %2810 = vst [vmem:[#allocation2 + $0x8] sm:$0xff] %v2686_v18 }
 0x3ca   :  { %v3267_v3 = vpop.f32.mrb[132].mxu1 }
 0x3cb   :  { %v2707_v59 = vadd.f32 %v3267_v3, %v5149_v58  ;;  %v2698_v19 = vpop.f32.mrb[133].mxu1 }
 0x3cc   :  { %v2699_v2 = vadd.f32 %v5149_v58, %v2698_v19  ;;  %v3268_v42 = vpop.f32.mrb[134].mxu1 }
 0x3cd   :  { %2815 = vst [vmem:[#allocation2 + $0x30] sm:$0xff] %v2707_v59  ;;  %v2710_v46 = vadd.f32 %v3268_v42, %v5149_v58  ;;  %v2701_v34 = vpop.f32.mrb[135].mxu1 }
 0x3ce   :  { %2813 = vst [vmem:[#allocation2 + $0x20] sm:$0xff] %v2699_v2  ;;  %v2702_v26 = vadd.f32 %v5149_v58, %v2701_v34 }
 0x3cf   :  { %2816 = vst [vmem:[#allocation2 + $0x38] sm:$0xff] %v2710_v46 }
 0x3d0   :  { %2814 = vst [vmem:[#allocation2 + $0x28] sm:$0xff] %v2702_v26 }
 0x3da   :  { %v3271_v43 = vpop.f32.mrb[136].mxu1 }
 0x3db   :  { %v2723_v27 = vadd.f32 %v3271_v43, %v5149_v58  ;;  %v2714_v47 = vpop.f32.mrb[137].mxu1 }
 0x3dc   :  { %v2715_v44 = vadd.f32 %v5149_v58, %v2714_v47  ;;  %v3272_v20 = vpop.f32.mrb[138].mxu1 }
 0x3dd   :  { %2819 = vst [vmem:[#allocation2 + $0x50] sm:$0xff] %v2723_v27  ;;  %v2726_v48 = vadd.f32 %v3272_v20, %v5149_v58  ;;  %v2717_v4 = vpop.f32.mrb[139].mxu1 }
 0x3de   :  { %2817 = vst [vmem:[#allocation2 + $0x40] sm:$0xff] %v2715_v44  ;;  %v2718_v21 = vadd.f32 %v5149_v58, %v2717_v4 }
 0x3df   :  { %2820 = vst [vmem:[#allocation2 + $0x58] sm:$0xff] %v2726_v48 }
 0x3e0   :  { %2818 = vst [vmem:[#allocation2 + $0x48] sm:$0xff] %v2718_v21 }
 0x3ea   :  { %v3275_v60 = vpop.f32.mrb[140].mxu1 }
 0x3eb   :  { %v2739_v61 = vadd.f32 %v3275_v60, %v5149_v58  ;;  %v2730_v11 = vpop.f32.mrb[141].mxu1 }
 0x3ec   :  { %v2731_v5 = vadd.f32 %v5149_v58, %v2730_v11  ;;  %v3276_v30 = vpop.f32.mrb[142].mxu1 }
 0x3ed   :  { %2823 = vst [vmem:[#allocation2 + $0x70] sm:$0xff] %v2739_v61  ;;  %v2742_v22 = vadd.f32 %v3276_v30, %v5149_v58  ;;  %v2733_v31 = vpop.f32.mrb[143].mxu1 }
 0x3ee   :  { %2821 = vst [vmem:[#allocation2 + $0x60] sm:$0xff] %v2731_v5  ;;  %v2734_v6 = vadd.f32 %v5149_v58, %v2733_v31 }
 0x3ef   :  { %2824 = vst [vmem:[#allocation2 + $0x78] sm:$0xff] %v2742_v22 }
 0x3f0   :  { %2822 = vst [vmem:[#allocation2 + $0x68] sm:$0xff] %v2734_v6 }
 0x3fa   :  { %v3279_v57 = vpop.f32.mrb[144].mxu1 }
 0x3fb   :  { %v2755_v36 = vadd.f32 %v3279_v57, %v5149_v58  ;;  %v2746_v7 = vpop.f32.mrb[145].mxu1 }
 0x3fc   :  { %v2747_v8 = vadd.f32 %v5149_v58, %v2746_v7  ;;  %v3280_v49 = vpop.f32.mrb[146].mxu1 }
 0x3fd   :  { %2827 = vst [vmem:[#allocation2 + $0x90] sm:$0xff] %v2755_v36  ;;  %v2758_v29 = vadd.f32 %v3280_v49, %v5149_v58  ;;  %v2749_v37 = vpop.f32.mrb[147].mxu1 }
 0x3fe   :  { %2825 = vst [vmem:[#allocation2 + $0x80] sm:$0xff] %v2747_v8  ;;  %v2750_v23 = vadd.f32 %v5149_v58, %v2749_v37 }
 0x3ff   :  { %2828 = vst [vmem:[#allocation2 + $0x98] sm:$0xff] %v2758_v29 }
 0x400   :  { %2826 = vst [vmem:[#allocation2 + $0x88] sm:$0xff] %v2750_v23 }
 0x40a   :  { %v3283_v50 = vpop.f32.mrb[148].mxu1 }
 0x40b   :  { %v2771_v54 = vadd.f32 %v3283_v50, %v5149_v58  ;;  %v2762_v24 = vpop.f32.mrb[149].mxu1 }
 0x40c   :  { %v2763_v40 = vadd.f32 %v5149_v58, %v2762_v24  ;;  %v3284_v51 = vpop.f32.mrb[150].mxu1 }
 0x40d   :  { %2831 = vst [vmem:[#allocation2 + $0xb0] sm:$0xff] %v2771_v54  ;;  %v2774_v9 = vadd.f32 %v3284_v51, %v5149_v58  ;;  %v2765_v25 = vpop.f32.mrb[151].mxu1 }
 0x40e   :  { %2829 = vst [vmem:[#allocation2 + $0xa0] sm:$0xff] %v2763_v40  ;;  %v2766_v15 = vadd.f32 %v5149_v58, %v2765_v25 }
 0x40f   :  { %2832 = vst [vmem:[#allocation2 + $0xb8] sm:$0xff] %v2774_v9 }
 0x410   :  { %2830 = vst [vmem:[#allocation2 + $0xa8] sm:$0xff] %v2766_v15 }
 0x41a   :  { %v3287_v38 = vpop.f32.mrb[152].mxu1 }
 0x41b   :  { %v2787_v10 = vadd.f32 %v3287_v38, %v5149_v58  ;;  %v2778_v53 = vpop.f32.mrb[153].mxu1 }
 0x41c   :  { %v2779_v63 = vadd.f32 %v5149_v58, %v2778_v53  ;;  %v3288_v12 = vpop.f32.mrb[154].mxu1 }
 0x41d   :  { %2835 = vst [vmem:[#allocation2 + $0xd0] sm:$0xff] %v2787_v10  ;;  %v2790_v55 = vadd.f32 %v3288_v12, %v5149_v58  ;;  %v2781_v39 = vpop.f32.mrb[155].mxu1 }
 0x41e   :  { %2833 = vst [vmem:[#allocation2 + $0xc0] sm:$0xff] %v2779_v63  ;;  %v2782_v14 = vadd.f32 %v5149_v58, %v2781_v39 }
 0x41f   :  { %2836 = vst [vmem:[#allocation2 + $0xd8] sm:$0xff] %v2790_v55 }
 0x420   :  { %2834 = vst [vmem:[#allocation2 + $0xc8] sm:$0xff] %v2782_v14 }
 0x42a   :  { %v3291_v45 = vpop.f32.mrb[156].mxu1 }
 0x42b   :  { %v2803_v13 = vadd.f32 %v3291_v45, %v5149_v58  ;;  %v2794_v62 = vpop.f32.mrb[157].mxu1 }
 0x42c   :  { %v2795_v32 = vadd.f32 %v5149_v58, %v2794_v62  ;;  %v3292_v35 = vpop.f32.mrb[158].mxu1 }
 0x42d   :  { %2839 = vst [vmem:[#allocation2 + $0xf0] sm:$0xff] %v2803_v13  ;;  %v2806_v0 = vadd.f32 %v3292_v35, %v5149_v58  ;;  %v2797_v33 = vpop.f32.mrb[159].mxu1 }
 0x42e   :  { %2837 = vst [vmem:[#allocation2 + $0xe0] sm:$0xff] %v2795_v32  ;;  %v2798_v16 = vadd.f32 %v5149_v58, %v2797_v33 }
 0x42f   :  { %2840 = vst [vmem:[#allocation2 + $0xf8] sm:$0xff] %v2806_v0 }
 0x430   :  { %2838 = vst [vmem:[#allocation2 + $0xe8] sm:$0xff] %v2798_v16 }
 0x431   :  { %3927 = shalt.err (!%p3924_p4)
}
 0x432   :  { %s3928_s27 = scalar_lea.hbm %s5202_s7, 4096 }
 0x433   :  { %p3929_p5 = scmp.ne.s32.totalorder %s5202_s7, %s3928_s27  ;;  %p3932_p6 = scmp.lt.u32.totalorder %s3928_s27, %s5202_s7 }
 0x435   :  { %p3934_p7 = pnand %p3932_p6, %p3929_p5 }
 0x437   :  { %3937 = shalt.err (!%p3934_p7)
}
 0x438   :  { %s3942_s2 = smov 128   ;;  %s3943_s8 = smov 8  }
 0x439   :  { %2852 = dma.vmem_to_hbm [thread:$0]  %s2847_s24, 4096, %s5202_s7, [#allocation3], %s3942_s2, %s3942_s2, %s3943_s8  }
 0x43a   :  { %3938 = dma.done.wait [#allocation3], 4096  }
 0x43b   :  { %3939 = vsyncadd [#allocation3], 4294963200 }
 0x43c   :  { %2856 = vsyncpa [#allocation3], 1 }

</bundles_post_ra>
